<compile_context>
chip_gen: v5e
topology: v5e:2x2
jax: 0.10.0
libtpu: 0.0.40
codegen_flags: <defaults>
</compile_context>

<pallas_src>
import jax
import jax.numpy as jnp
import numpy as np
from jax.experimental import pallas as pl
from jax.experimental.pallas import tpu as pltpu

C_IN = 512   # conv_transpose_1 in_channels
C_MID = 512  # conv_transpose_1 out_channels / conv_transpose_2 in_channels
C_OUT = 128  # conv_transpose_2 out_channels


def _fused_convT_kernel(x_ref, w1_ref, b1_ref, w2_ref, b2_ref, o_ref):
    # x_ref : (L, C_IN)        bf16   one batch, channels-last
    # w1_ref: (C_IN, 2*C_MID)  bf16   [tap0 | tap1] of conv_transpose_1
    # b1_ref: (1, C_MID)       f32
    # w2_ref: (C_MID, 2*C_OUT) bf16   [tap1 | tap0] of conv_transpose_2
    # b2_ref: (1, C_OUT)       f32
    # o_ref : (L-2, 2*C_OUT)   f32    lanes [0:128)=even pos, [128:256)=odd
    L = x_ref.shape[0]
    l_out = o_ref.shape[0]            # L - 2

    x = x_ref[...]                                                    # bf16
    # Layer 1: both taps in one MXU push (M=L, K=512, N=1024), f32 accumulate.
    y1 = jnp.dot(x, w1_ref[...], preferred_element_type=jnp.float32)

    # ConvTranspose1d(512,512,k=2,s=1,p=1):
    #   h[m] = x[m+1] @ W1[:,:,0] + x[m] @ W1[:,:,1] + b1 ,  m = 0 .. L-2
    # roll(tap0, L-1) shifts rows "up by one" on the XLU (no sublane-offset
    # slice / relayout); the wrapped row L-1 is finite garbage, never stored.
    t0_up = pltpu.roll(y1[:, :C_MID], shift=L - 1, axis=0)
    h = t0_up + y1[:, C_MID:] + b1_ref[...]
    h = jnp.tanh(jnp.maximum(h, 0.0)).astype(jnp.bfloat16)            # relu -> tanh

    # Layer 2: both taps in one MXU push (M=L, K=512, N=256).
    y2 = jnp.dot(h, w2_ref[...], preferred_element_type=jnp.float32)  # (L, 256)

    # ConvTranspose1d(512,128,k=2,s=2,p=1), even/odd packed into lane halves:
    #   out[j, 0:128)   = even[j] = h[j]   @ W2[:,:,1]
    #   out[j, 128:256) = odd[j]  = h[j+1] @ W2[:,:,0]
    b2 = b2_ref[...]
    even = jax.nn.sigmoid(jnp.maximum(y2[:, :C_OUT] + b2, 0.0))       # relu -> sigmoid
    odd_src = pltpu.roll(y2[:, C_OUT:], shift=L - 1, axis=0)          # y2[j+1, 128:]
    odd = jax.nn.sigmoid(jnp.maximum(odd_src + b2, 0.0))

    # Two vreg-aligned lane-half stores; only the first L-2 rows are valid.
    o_ref[:, :C_OUT] = even[:l_out]
    o_ref[:, C_OUT:] = odd[:l_out]


def model_forward(x_ncl, w1, b1, w2, b2):
    """x_ncl: (N, 512, L) float32, PyTorch NCL layout. Returns (N, 128, 2L-4)."""
    N, Cin, L = x_ncl.shape
    assert Cin == C_IN and L >= 3
    Lout = 2 * (L - 1) - 2            # length after both transposed convs

    # channels-last activations, bf16 MXU feed; biases stay f32.
    x_nlc = jnp.transpose(x_ncl, (0, 2, 1)).astype(jnp.bfloat16)      # (N, L, 512)
    w1_cat = jnp.concatenate([w1[:, :, 0], w1[:, :, 1]], axis=1).astype(jnp.bfloat16)
    w2_cat = jnp.concatenate([w2[:, :, 1], w2[:, :, 0]], axis=1).astype(jnp.bfloat16)
    b1_2d = b1.reshape(1, C_MID).astype(jnp.float32)
    b2_2d = b2.reshape(1, C_OUT).astype(jnp.float32)

    # Advisory cost hint so XLA schedules the custom call sensibly.
    flops = N * (2 * L * C_IN * (2 * C_MID) + 2 * L * C_MID * (2 * C_OUT))
    transcendentals = N * L * (C_MID + 2 * C_OUT)
    bytes_accessed = (N * L * C_IN * 2                      # x (bf16)
                      + C_IN * 2 * C_MID * 2                # w1_cat (bf16)
                      + C_MID * 2 * C_OUT * 2               # w2_cat (bf16)
                      + (C_MID + C_OUT) * 4                 # biases (f32)
                      + N * (L - 2) * 2 * C_OUT * 4)        # output (f32)

    out_blk = pl.pallas_call(
        _fused_convT_kernel,
        out_shape=jax.ShapeDtypeStruct((N, L - 2, 2 * C_OUT), jnp.float32),
        grid=(N,),
        in_specs=[
            # per-batch activation tile (pipelined / double-buffered)
            pl.BlockSpec((None, L, C_IN), lambda n: (n, 0, 0)),
            # grid-invariant weights & biases: DMA'd once, VMEM-resident
            pl.BlockSpec((C_IN, 2 * C_MID), lambda n: (0, 0)),
            pl.BlockSpec((1, C_MID), lambda n: (0, 0)),
            pl.BlockSpec((C_MID, 2 * C_OUT), lambda n: (0, 0)),
            pl.BlockSpec((1, C_OUT), lambda n: (0, 0)),
        ],
        out_specs=pl.BlockSpec((None, L - 2, 2 * C_OUT), lambda n: (n, 0, 0)),
        compiler_params=pltpu.CompilerParams(
            dimension_semantics=("parallel",)),            # v7x: 2 TCs split batches
        cost_estimate=pl.CostEstimate(flops=flops,
                                      transcendentals=transcendentals,
                                      bytes_accessed=bytes_accessed),
    )(x_nlc, w1_cat, b1_2d, w2_cat, b2_2d)

    # even/odd interleave is a free contiguous reshape (lane-dense layout),
    # then back to PyTorch NCL.
    out_nlc = out_blk.reshape(N, Lout, C_OUT)
    return jnp.transpose(out_nlc, (0, 2, 1))


# ----------------------- pure-JAX f32 reference (for checking) --------------
def _conv_transpose1d_ref(x, w, b, stride, padding):
    # x: (N, Cin, L), w: (Cin, Cout, K) PyTorch layout, b: (Cout,)
    K = w.shape[-1]
    w_t = jnp.transpose(w[:, :, ::-1], (1, 0, 2))  # (Cout, Cin, K), flipped
    out = jax.lax.conv_general_dilated(
        x, w_t, window_strides=(1,),
        padding=[(K - 1 - padding, K - 1 - padding)],
        lhs_dilation=(stride,),
        dimension_numbers=('NCH', 'OIH', 'NCH'))
    return out + b[None, :, None]


def reference_forward(x, w1, b1, w2, b2):
    v1 = _conv_transpose1d_ref(x, w1, b1, stride=1, padding=1)
    v3 = jnp.tanh(jax.nn.relu(v1))
    v4 = _conv_transpose1d_ref(v3, w2, b2, stride=2, padding=1)
    return jax.nn.sigmoid(jax.nn.relu(v4))


if __name__ == "__main__":
    key = jax.random.PRNGKey(0)
    kx, k1, k2, k3, k4 = jax.random.split(key, 5)

    N, L = 2, 16
    x = jax.random.normal(kx, (N, C_IN, L), dtype=jnp.float32)

    # Deterministic params, PyTorch-default-style uniform init.
    bound1 = 1.0 / np.sqrt(C_IN * 2)
    w1 = jax.random.uniform(k1, (C_IN, C_MID, 2), jnp.float32, -bound1, bound1)
    b1 = jax.random.uniform(k2, (C_MID,), jnp.float32, -bound1, bound1)
    bound2 = 1.0 / np.sqrt(C_MID * 2)
    w2 = jax.random.uniform(k3, (C_MID, C_OUT, 2), jnp.float32, -bound2, bound2)
    b2 = jax.random.uniform(k4, (C_OUT,), jnp.float32, -bound2, bound2)

    out = jax.jit(model_forward)(x, w1, b1, w2, b2)
    out = jax.block_until_ready(out)

    ref = reference_forward(x, w1, b1, w2, b2)
    assert out.shape == (N, C_OUT, 2 * L - 4), out.shape
    # bf16 weights/activations on the MXU (f32 accumulation): loosened tolerance.
    np.testing.assert_allclose(np.asarray(out), np.asarray(ref),
                               rtol=1e-2, atol=1e-2)
    print("KERNEL_OK")
</pallas_src>

<mosaic_0001>
module attributes {stable_mosaic.version = 11 : i64} {
  func.func @_fused_convT_kernel(%arg0: i32, %arg1: memref<1x16x512xbf16, #tpu.memory_space<vmem>>, %arg2: memref<512x1024xbf16, #tpu.memory_space<vmem>>, %arg3: memref<1x512xf32, #tpu.memory_space<vmem>>, %arg4: memref<512x256xbf16, #tpu.memory_space<vmem>>, %arg5: memref<1x128xf32, #tpu.memory_space<vmem>>, %arg6: memref<1x14x256xf32, #tpu.memory_space<vmem>>) attributes {dimension_semantics = [#tpu.dimension_semantics<parallel>], iteration_bounds = array<i64: 2>, scalar_prefetch = 0 : i64, scratch_operands = 0 : i64, tpu.core_type = #tpu.core_type<tc>, window_params = [{transform_indices = @transform_0, window_bounds = array<i64: 1, 16, 512>}, {pipeline_mode = #tpu.pipeline_mode<synchronous>, transform_indices = @transform_1, window_bounds = array<i64: 512, 1024>}, {pipeline_mode = #tpu.pipeline_mode<synchronous>, transform_indices = @transform_2, window_bounds = array<i64: 1, 512>}, {pipeline_mode = #tpu.pipeline_mode<synchronous>, transform_indices = @transform_3, window_bounds = array<i64: 512, 256>}, {pipeline_mode = #tpu.pipeline_mode<synchronous>, transform_indices = @transform_4, window_bounds = array<i64: 1, 128>}, {transform_indices = @transform_5, window_bounds = array<i64: 1, 14, 256>}]} {
    %c0 = arith.constant 0 : index
    %c0_0 = arith.constant 0 : index
    %c0_1 = arith.constant 0 : index
    %0 = vector.load %arg1[%c0, %c0_0, %c0_1] : memref<1x16x512xbf16, #tpu.memory_space<vmem>>, vector<1x16x512xbf16>
    %1 = vector.shape_cast %0 : vector<1x16x512xbf16> to vector<16x512xbf16>
    %c0_2 = arith.constant 0 : index
    %c0_3 = arith.constant 0 : index
    %2 = vector.load %arg2[%c0_2, %c0_3] : memref<512x1024xbf16, #tpu.memory_space<vmem>>, vector<512x1024xbf16>
    %cst = arith.constant dense<0.000000e+00> : vector<16x1024xf32>
    %3 = tpu.matmul %1, %2, %cst {dimension_numbers = #tpu.dot_dimension_numbers<[1], [0], [0], [1], [0, 0, 1, 1], [], []>} : vector<16x512xbf16>, vector<512x1024xbf16>, vector<16x1024xf32> -> vector<16x1024xf32>
    %4 = vector.extract_strided_slice %3 {offsets = [0, 0], sizes = [16, 512], strides = [1, 1]} : vector<16x1024xf32> to vector<16x512xf32>
    %c15_i32 = arith.constant 15 : i32
    %5 = tpu.dynamic_rotate %4 by %c15_i32 dim 0 : vector<16x512xf32>, i32 -> vector<16x512xf32>
    %6 = vector.extract_strided_slice %3 {offsets = [0, 512], sizes = [16, 512], strides = [1, 1]} : vector<16x1024xf32> to vector<16x512xf32>
    %7 = arith.addf %5, %6 : vector<16x512xf32>
    %c0_4 = arith.constant 0 : index
    %c0_5 = arith.constant 0 : index
    %8 = vector.load %arg3[%c0_4, %c0_5] : memref<1x512xf32, #tpu.memory_space<vmem>>, vector<1x512xf32>
    %9 = vector.broadcast %8 : vector<1x512xf32> to vector<16x512xf32>
    %10 = arith.addf %7, %9 : vector<16x512xf32>
    %cst_6 = arith.constant 0.000000e+00 : f32
    %11 = vector.broadcast %cst_6 : f32 to vector<16x512xf32>
    %12 = arith.maximumf %10, %11 : vector<16x512xf32>
    %13 = math.tanh %12 : vector<16x512xf32>
    %14 = arith.truncf %13 : vector<16x512xf32> to vector<16x512xbf16>
    %c0_7 = arith.constant 0 : index
    %c0_8 = arith.constant 0 : index
    %15 = vector.load %arg4[%c0_7, %c0_8] : memref<512x256xbf16, #tpu.memory_space<vmem>>, vector<512x256xbf16>
    %cst_9 = arith.constant dense<0.000000e+00> : vector<16x256xf32>
    %16 = tpu.matmul %14, %15, %cst_9 {dimension_numbers = #tpu.dot_dimension_numbers<[1], [0], [0], [1], [0, 0, 1, 1], [], []>} : vector<16x512xbf16>, vector<512x256xbf16>, vector<16x256xf32> -> vector<16x256xf32>
    %c0_10 = arith.constant 0 : index
    %c0_11 = arith.constant 0 : index
    %17 = vector.load %arg5[%c0_10, %c0_11] : memref<1x128xf32, #tpu.memory_space<vmem>>, vector<1x128xf32>
    %18 = vector.extract_strided_slice %16 {offsets = [0, 0], sizes = [16, 128], strides = [1, 1]} : vector<16x256xf32> to vector<16x128xf32>
    %19 = vector.broadcast %17 : vector<1x128xf32> to vector<16x128xf32>
    %20 = arith.addf %18, %19 : vector<16x128xf32>
    %cst_12 = arith.constant 0.000000e+00 : f32
    %21 = vector.broadcast %cst_12 : f32 to vector<16x128xf32>
    %22 = arith.maximumf %20, %21 : vector<16x128xf32>
    %23 = arith.negf %22 : vector<16x128xf32>
    %24 = math.exp %23 : vector<16x128xf32>
    %cst_13 = arith.constant 1.000000e+00 : f32
    %25 = vector.broadcast %cst_13 : f32 to vector<16x128xf32>
    %26 = arith.addf %25, %24 : vector<16x128xf32>
    %27 = arith.divf %25, %26 : vector<16x128xf32>
    %28 = vector.extract_strided_slice %16 {offsets = [0, 128], sizes = [16, 128], strides = [1, 1]} : vector<16x256xf32> to vector<16x128xf32>
    %c15_i32_14 = arith.constant 15 : i32
    %29 = tpu.dynamic_rotate %28 by %c15_i32_14 dim 0 : vector<16x128xf32>, i32 -> vector<16x128xf32>
    %30 = vector.broadcast %17 : vector<1x128xf32> to vector<16x128xf32>
    %31 = arith.addf %29, %30 : vector<16x128xf32>
    %cst_15 = arith.constant 0.000000e+00 : f32
    %32 = vector.broadcast %cst_15 : f32 to vector<16x128xf32>
    %33 = arith.maximumf %31, %32 : vector<16x128xf32>
    %34 = arith.negf %33 : vector<16x128xf32>
    %35 = math.exp %34 : vector<16x128xf32>
    %cst_16 = arith.constant 1.000000e+00 : f32
    %36 = vector.broadcast %cst_16 : f32 to vector<16x128xf32>
    %37 = arith.addf %36, %35 : vector<16x128xf32>
    %38 = arith.divf %36, %37 : vector<16x128xf32>
    %39 = vector.extract_strided_slice %27 {offsets = [0, 0], sizes = [14, 128], strides = [1, 1]} : vector<16x128xf32> to vector<14x128xf32>
    %c0_17 = arith.constant 0 : index
    %c0_18 = arith.constant 0 : index
    %c0_19 = arith.constant 0 : index
    %40 = vector.load %arg6[%c0_17, %c0_18, %c0_19] : memref<1x14x256xf32, #tpu.memory_space<vmem>>, vector<1x14x128xf32>
    %41 = vector.shape_cast %40 : vector<1x14x128xf32> to vector<14x128xf32>
    %42 = vector.shape_cast %39 : vector<14x128xf32> to vector<1x14x128xf32>
    tpu.vector_store %arg6[%c0_17, %c0_18, %c0_19], %42 {strides = array<i32>} : memref<1x14x256xf32, #tpu.memory_space<vmem>>, vector<1x14x128xf32>,
    %43 = vector.extract_strided_slice %38 {offsets = [0, 0], sizes = [14, 128], strides = [1, 1]} : vector<16x128xf32> to vector<14x128xf32>
    %c0_20 = arith.constant 0 : index
    %c0_21 = arith.constant 0 : index
    %c128 = arith.constant 128 : index
    %44 = vector.load %arg6[%c0_20, %c0_21, %c128] : memref<1x14x256xf32, #tpu.memory_space<vmem>>, vector<1x14x128xf32>
    %45 = vector.shape_cast %44 : vector<1x14x128xf32> to vector<14x128xf32>
    %46 = vector.shape_cast %43 : vector<14x128xf32> to vector<1x14x128xf32>
    tpu.vector_store %arg6[%c0_20, %c0_21, %c128], %46 {strides = array<i32>} : memref<1x14x256xf32, #tpu.memory_space<vmem>>, vector<1x14x128xf32>,
    return
  }
  func.func @transform_0(%arg0: i32) -> (i32, i32, i32) {
    %c0_i32 = arith.constant 0 : i32
    %c0_i32_0 = arith.constant 0 : i32
    %c0_i32_1 = arith.constant 0 : i32
    return %arg0, %c0_i32, %c0_i32_0 : i32, i32, i32
  }
  func.func @transform_1(%arg0: i32) -> (i32, i32) {
    %c0_i32 = arith.constant 0 : i32
    %c0_i32_0 = arith.constant 0 : i32
    %c0_i32_1 = arith.constant 0 : i32
    return %c0_i32, %c0_i32_0 : i32, i32
  }
  func.func @transform_2(%arg0: i32) -> (i32, i32) {
    %c0_i32 = arith.constant 0 : i32
    %c0_i32_0 = arith.constant 0 : i32
    %c0_i32_1 = arith.constant 0 : i32
    return %c0_i32, %c0_i32_0 : i32, i32
  }
  func.func @transform_3(%arg0: i32) -> (i32, i32) {
    %c0_i32 = arith.constant 0 : i32
    %c0_i32_0 = arith.constant 0 : i32
    %c0_i32_1 = arith.constant 0 : i32
    return %c0_i32, %c0_i32_0 : i32, i32
  }
  func.func @transform_4(%arg0: i32) -> (i32, i32) {
    %c0_i32 = arith.constant 0 : i32
    %c0_i32_0 = arith.constant 0 : i32
    %c0_i32_1 = arith.constant 0 : i32
    return %c0_i32, %c0_i32_0 : i32, i32
  }
  func.func @transform_5(%arg0: i32) -> (i32, i32, i32) {
    %c0_i32 = arith.constant 0 : i32
    %c0_i32_0 = arith.constant 0 : i32
    %c0_i32_1 = arith.constant 0 : i32
    return %arg0, %c0_i32, %c0_i32_0 : i32, i32, i32
  }
}

</mosaic_0001>

<bundles_post_ra>
// kernel: model_forward.1
= control target key start
LH: loop header
LB: loop body
LE: loop exit
PB: predicated region body
PF: predicated region fallthrough
CT: control target
= control target key end

     0   :  { %s4661_s18 = smov 0   ;;  %s6726_s0 = inlined_call_operand.vmem [shape: bf16[2,16,512], index: 0, kind: input, shape index: {}]   ;;  %s6727_s1 = inlined_call_operand.vmem [shape: bf16[512,1024], index: 1, kind: input, shape index: {}]   ;;  %s6728_s2 = inlined_call_operand.vmem [shape: f32[1,512], index: 2, kind: input, shape index: {}]   ;;  %s6729_s3 = inlined_call_operand.vmem [shape: bf16[512,256], index: 3, kind: input, shape index: {}]   ;;  %s6730_s4 = inlined_call_operand.vmem [shape: f32[1,128], index: 4, kind: input, shape index: {}]   ;;  %s6731_s5 = inlined_call_operand.vmem [shape: f32[2,14,256], index: 5, kind: output, shape index: {}]  }
   0x1 LB: > { %s2945_s19 = sadd.s32 4294967295, %s4629_s18   ;;  %p2949_p0 = scmp.ge.s32.totalorder %s4629_s18, 1  ;;  %s4629_s18 = sphi %s4661_s18, %s15_s18  }
   0x2   : > { %p187_p1 = scmp.lt.s32.totalorder %s4629_s18, 3 }
   0x4   : > { %p188_p2 = pnand %p2949_p0, %p187_p1 }
   0x5   : > { %p215_p3 = scmp.lt.s32.totalorder (!%p188_p2), %s2945_s19, 1 }
   0x6   : > { %191 = sbr.rel (%p188_p2) target bundleno = 656 (0x290), region = 40 }
   0xb   : > { %v3196_v0 = vld [vmem:[%s6727_s1 + $0x1c0] sm:$0xf]  ;;  %s6733_s19 = smov (!%p215_p3, %s2945_s19), 1 }
   0xc   : > { %v4322_v1 = vld [vmem:[%s6727_s1 + $0x1dc] sm:$0xf0]  ;;  %s4256_s13 = sshll.u32 %s6733_s19, 5 }
   0xd   : > { %v3452_v2 = vld [vmem:[%s6727_s1 + $0x3c0] sm:$0xf]  ;;  %v3197_v3 = vor.u32 %v4322_v1, %v3196_v0  ;;  %s219_s24 = scalar_lea.vmem %s6726_s0, %s4256_s13  ;;  %s6717_s25 = scalar_lea.vmem %s6731_s5, %s4256_s13 }
   0xe   : > { %v4386_v4 = vld [vmem:[%s6727_s1 + $0x3dc] sm:$0xf0] }
   0xf   : > { %v3708_v5 = vld [vmem:[%s6727_s1 + $0x5c0] sm:$0xf]  ;;  %v3453_v7 = vor.u32 %v4386_v4, %v3452_v2  ;;  %1785 = vmatpush.bf16.msra.mxu0 %v3197_v3 }
  0x10   : > { %v4450_v6 = vld [vmem:[%s6727_s1 + $0x5dc] sm:$0xf0] }
  0x11   : > { %v3709_v8 = vor.u32 %v4450_v6, %v3708_v5  ;;  %v3964_v9 = vld [vmem:[%s6727_s1 + $0x7c0] sm:$0xf]  ;;  %1799 = vmatpush.bf16.msra.mxu1 %v3453_v7 }
  0x12   : > { %v4514_v10 = vld [vmem:[%s6727_s1 + $0x7dc] sm:$0xf0] }
  0x13   : > { %v3164_v11 = vld [vmem:[%s6727_s1 + $0x180] sm:$0xf]  ;;  %v3965_v12 = vor.u32 %v4514_v10, %v3964_v9  ;;  %1813 = vmatpush.bf16.msra.mxu2 %v3709_v8 }
  0x14   : > { %v4314_v13 = vld [vmem:[%s6727_s1 + $0x19c] sm:$0xf0] }
  0x15   : > { %v3420_v14 = vld [vmem:[%s6727_s1 + $0x380] sm:$0xf]  ;;  %v3165_v16 = vor.u32 %v4314_v13, %v3164_v11  ;;  %1827 = vmatpush.bf16.msra.mxu3 %v3965_v12 }
  0x16   : > { %v4378_v15 = vld [vmem:[%s6727_s1 + $0x39c] sm:$0xf0] }
  0x17   : > { %v3421_v17 = vor.u32 %v4378_v15, %v3420_v14  ;;  %v3676_v18 = vld [vmem:[%s6727_s1 + $0x580] sm:$0xf]  ;;  %1786 = vmatpush.bf16.msra.mxu0 %v3165_v16 }
  0x18   : > { %v4442_v19 = vld [vmem:[%s6727_s1 + $0x59c] sm:$0xf0] }
  0x19   : > { %v3932_v20 = vld [vmem:[%s6727_s1 + $0x780] sm:$0xf]  ;;  %v3677_v21 = vor.u32 %v4442_v19, %v3676_v18  ;;  %1800 = vmatpush.bf16.msra.mxu1 %v3421_v17 }
  0x1a   : > { %v4506_v22 = vld [vmem:[%s6727_s1 + $0x79c] sm:$0xf0] }
  0x1b   : > { %v3132_v23 = vld [vmem:[%s6727_s1 + $0x140] sm:$0xf]  ;;  %v3933_v25 = vor.u32 %v4506_v22, %v3932_v20  ;;  %1814 = vmatpush.bf16.msra.mxu2 %v3677_v21 }
  0x1c   : > { %v4306_v24 = vld [vmem:[%s6727_s1 + $0x15c] sm:$0xf0] }
  0x1d   : > { %v3388_v26 = vld [vmem:[%s6727_s1 + $0x340] sm:$0xf]  ;;  %v3133_v29 = vor.u32 %v4306_v24, %v3132_v23  ;;  %1828 = vmatpush.bf16.msra.mxu3 %v3933_v25 }
  0x1e   : > { %v4370_v27 = vld [vmem:[%s6727_s1 + $0x35c] sm:$0xf0] }
  0x1f   : > { %v3644_v28 = vld [vmem:[%s6727_s1 + $0x540] sm:$0xf]  ;;  %v3389_v33 = vor.u32 %v4370_v27, %v3388_v26  ;;  %1787 = vmatpush.bf16.msra.mxu0 %v3133_v29  ;;  %v3198_v29 = vld [vmem:[%s6727_s1 + $0x1e0] sm:$0xf0] }
  0x20   : > { %v4434_v30 = vld [vmem:[%s6727_s1 + $0x55c] sm:$0xf0] }
  0x21   : > { %v3900_v31 = vld [vmem:[%s6727_s1 + $0x740] sm:$0xf]  ;;  %v3645_v34 = vor.u32 %v4434_v30, %v3644_v28  ;;  %1801 = vmatpush.bf16.msra.mxu1 %v3389_v33  ;;  %v4318_v28 = vld [vmem:[%s6727_s1 + $0x1c4] sm:$0xf] }
  0x22   : > { %v4498_v32 = vld [vmem:[%s6727_s1 + $0x75c] sm:$0xf0]  ;;  %v4382_v30 = vld [vmem:[%s6727_s1 + $0x3c4] sm:$0xf] }
  0x23   : > { %v3100_v35 = vld [vmem:[%s6727_s1 + $0x100] sm:$0xf]  ;;  %v3901_v38 = vor.u32 %v4498_v32, %v3900_v31  ;;  %1815 = vmatpush.bf16.msra.mxu2 %v3645_v34  ;;  %v3454_v32 = vld [vmem:[%s6727_s1 + $0x3e0] sm:$0xf0] }
  0x24   : > { %v4298_v36 = vld [vmem:[%s6727_s1 + $0x11c] sm:$0xf0]  ;;  %v4446_v33 = vld [vmem:[%s6727_s1 + $0x5c4] sm:$0xf] }
  0x25   : > { %v3356_v37 = vld [vmem:[%s6727_s1 + $0x300] sm:$0xf]  ;;  %v3101_v44 = vor.u32 %v4298_v36, %v3100_v35  ;;  %1829 = vmatpush.bf16.msra.mxu3 %v3901_v38  ;;  %v3710_v34 = vld [vmem:[%s6727_s1 + $0x5e0] sm:$0xf0] }
  0x26   : > { %v4362_v39 = vld [vmem:[%s6727_s1 + $0x31c] sm:$0xf0]  ;;  %v3966_v38 = vld [vmem:[%s6727_s1 + $0x7e0] sm:$0xf0] }
  0x27   : > { %v3612_v40 = vld [vmem:[%s6727_s1 + $0x500] sm:$0xf]  ;;  %v3357_v45 = vor.u32 %v4362_v39, %v3356_v37  ;;  %1788 = vmatpush.bf16.msra.mxu0 %v3101_v44  ;;  %v4510_v37 = vld [vmem:[%s6727_s1 + $0x7c4] sm:$0xf] }
  0x28   : > { %v4426_v41 = vld [vmem:[%s6727_s1 + $0x51c] sm:$0xf0]  ;;  %v3166_v44 = vld [vmem:[%s6727_s1 + $0x1a0] sm:$0xf0] }
  0x29   : > { %v3868_v42 = vld [vmem:[%s6727_s1 + $0x700] sm:$0xf]  ;;  %v3613_v46 = vor.u32 %v4426_v41, %v3612_v40  ;;  %1802 = vmatpush.bf16.msra.mxu1 %v3357_v45  ;;  %v3201_v40 = vor.u32 %v4318_v28, %v3198_v29  ;;  %v3457_v41 = vor.u32 %v4382_v30, %v3454_v32  ;;  %v4374_v45 = vld [vmem:[%s6727_s1 + $0x384] sm:$0xf]  ;;  %v2966_v28 = vld [vmem:[%s219_s24 + $0x18] sm:$0xf0] }
  0x2a   : > { %v4490_v43 = vld [vmem:[%s6727_s1 + $0x71c] sm:$0xf0]  ;;  %v4260_v30 = vld [vmem:[%s219_s24 + $0xc] sm:$0xf0] }
  0x2b   : > { %v3068_v47 = vld [vmem:[%s6727_s1 + $0xc0] sm:$0xf]  ;;  %v3869_v50 = vor.u32 %v4490_v43, %v3868_v42  ;;  %1816 = vmatpush.bf16.msra.mxu2 %v3613_v46  ;;  %v3713_v42 = vor.u32 %v4446_v33, %v3710_v34  ;;  %v4310_v43 = vld [vmem:[%s6727_s1 + $0x184] sm:$0xf]  ;;  %v3969_v46 = vor.u32 %v4510_v37, %v3966_v38 }
  0x2c   : > { %v4290_v48 = vld [vmem:[%s6727_s1 + $0xdc] sm:$0xf0]  ;;  %v4258_v34 = vld [vmem:[%s219_s24 + $0x4] sm:$0xf] }
  0x2d   : > { %v3324_v49 = vld [vmem:[%s6727_s1 + $0x2c0] sm:$0xf]  ;;  %v3069_v56 = vor.u32 %v4290_v48, %v3068_v47  ;;  %1830 = vmatpush.bf16.msra.mxu3 %v3869_v50  ;;  %v3422_v47 = vld [vmem:[%s6727_s1 + $0x3a0] sm:$0xf0] }
  0x2e   : > { %v4354_v51 = vld [vmem:[%s6727_s1 + $0x2dc] sm:$0xf0]  ;;  %v4438_v48 = vld [vmem:[%s6727_s1 + $0x584] sm:$0xf] }
  0x2f   : > { %v3580_v52 = vld [vmem:[%s6727_s1 + $0x4c0] sm:$0xf]  ;;  %v3325_v57 = vor.u32 %v4354_v51, %v3324_v49  ;;  %1789 = vmatpush.bf16.msra.mxu0 %v3069_v56  ;;  %v3678_v49 = vld [vmem:[%s6727_s1 + $0x5a0] sm:$0xf0] }
  0x30   : > { %v4418_v53 = vld [vmem:[%s6727_s1 + $0x4dc] sm:$0xf0]  ;;  %v4502_v50 = vld [vmem:[%s6727_s1 + $0x784] sm:$0xf] }
  0x31   : > { %v3836_v54 = vld [vmem:[%s6727_s1 + $0x6c0] sm:$0xf]  ;;  %v3581_v58 = vor.u32 %v4418_v53, %v3580_v52  ;;  %1803 = vmatpush.bf16.msra.mxu1 %v3325_v57  ;;  %v3934_v51 = vld [vmem:[%s6727_s1 + $0x7a0] sm:$0xf0]  ;;  %v3169_v52 = vor.u32 %v4310_v43, %v3166_v44  ;;  %v3425_v53 = vor.u32 %v4374_v45, %v3422_v47 }
  0x32   : > { %v4482_v55 = vld [vmem:[%s6727_s1 + $0x6dc] sm:$0xf0]  ;;  %v3134_v56 = vld [vmem:[%s6727_s1 + $0x160] sm:$0xf0] }
  0x33   : > { %v3036_v59 = vld [vmem:[%s6727_s1 + $0x80] sm:$0xf]  ;;  %v3837_v62 = vor.u32 %v4482_v55, %v3836_v54  ;;  %1817 = vmatpush.bf16.msra.mxu2 %v3581_v58  ;;  %v3681_v54 = vor.u32 %v4438_v48, %v3678_v49  ;;  %v4302_v55 = vld [vmem:[%s6727_s1 + $0x144] sm:$0xf]  ;;  %v3937_v58 = vor.u32 %v4502_v50, %v3934_v51 }
  0x34   : > { %v4282_v60 = vld [vmem:[%s6727_s1 + $0x9c] sm:$0xf0]  ;;  %v4366_v57 = vld [vmem:[%s6727_s1 + $0x344] sm:$0xf] }
  0x35   : > { %v3292_v61 = vld [vmem:[%s6727_s1 + $0x280] sm:$0xf]  ;;  %v3037_v4 = vor.u32 %v4282_v60, %v3036_v59  ;;  %1831 = vmatpush.bf16.msra.mxu3 %v3837_v62  ;;  %v3390_v59 = vld [vmem:[%s6727_s1 + $0x360] sm:$0xf0] }
  0x36   : > { %v4346_v63 = vld [vmem:[%s6727_s1 + $0x29c] sm:$0xf0]  ;;  %v4430_v60 = vld [vmem:[%s6727_s1 + $0x544] sm:$0xf] }
  0x37   : > { %v3548_v0 = vld [vmem:[%s6727_s1 + $0x480] sm:$0xf]  ;;  %v3293_v5 = vor.u32 %v4346_v63, %v3292_v61  ;;  %1790 = vmatpush.bf16.msra.mxu0 %v3037_v4  ;;  %v3646_v61 = vld [vmem:[%s6727_s1 + $0x560] sm:$0xf0] }
  0x38   : > { %v4410_v1 = vld [vmem:[%s6727_s1 + $0x49c] sm:$0xf0]  ;;  %v4494_v62 = vld [vmem:[%s6727_s1 + $0x744] sm:$0xf]  ;;  %v3649_v4 = vor.u32 %v4430_v60, %v3646_v61 }
  0x39   : > { %v3804_v2 = vld [vmem:[%s6727_s1 + $0x680] sm:$0xf]  ;;  %v3549_v6 = vor.u32 %v4410_v1, %v3548_v0  ;;  %1804 = vmatpush.bf16.msra.mxu1 %v3293_v5  ;;  %v3902_v63 = vld [vmem:[%s6727_s1 + $0x760] sm:$0xf0]  ;;  %v3137_v0 = vor.u32 %v4302_v55, %v3134_v56 }
  0x3a   : > { %v4474_v3 = vld [vmem:[%s6727_s1 + $0x69c] sm:$0xf0]  ;;  %v4294_v1 = vld [vmem:[%s6727_s1 + $0x104] sm:$0xf] }
  0x3b   : > { %v3004_v7 = vld [vmem:[%s6727_s1 + $0x40] sm:$0xf]  ;;  %v3805_v10 = vor.u32 %v4474_v3, %v3804_v2  ;;  %1818 = vmatpush.bf16.msra.mxu2 %v3549_v6  ;;  %v3102_v2 = vld [vmem:[%s6727_s1 + $0x120] sm:$0xf0]  ;;  %v3393_v3 = vor.u32 %v4366_v57, %v3390_v59 }
  0x3c   : > { %v4274_v8 = vld [vmem:[%s6727_s1 + $0x5c] sm:$0xf0]  ;;  %v4358_v5 = vld [vmem:[%s6727_s1 + $0x304] sm:$0xf] }
  0x3d   : > { %v3260_v9 = vld [vmem:[%s6727_s1 + $0x240] sm:$0xf]  ;;  %v3005_v16 = vor.u32 %v4274_v8, %v3004_v7  ;;  %1832 = vmatpush.bf16.msra.mxu3 %v3805_v10  ;;  %v3358_v6 = vld [vmem:[%s6727_s1 + $0x320] sm:$0xf0]  ;;  %v3905_v8 = vor.u32 %v4494_v62, %v3902_v63 }
  0x3e   : > { %v4338_v11 = vld [vmem:[%s6727_s1 + $0x25c] sm:$0xf0]  ;;  %v4422_v7 = vld [vmem:[%s6727_s1 + $0x504] sm:$0xf] }
  0x3f   : > { %v3516_v12 = vld [vmem:[%s6727_s1 + $0x440] sm:$0xf]  ;;  %v3261_v19 = vor.u32 %v4338_v11, %v3260_v9  ;;  %1791 = vmatpush.bf16.msra.mxu0 %v3005_v16  ;;  %v3614_v9 = vld [vmem:[%s6727_s1 + $0x520] sm:$0xf0] }
  0x40   : > { %v4402_v13 = vld [vmem:[%s6727_s1 + $0x45c] sm:$0xf0]  ;;  %v4486_v10 = vld [vmem:[%s6727_s1 + $0x704] sm:$0xf] }
  0x41   : > { %v3772_v14 = vld [vmem:[%s6727_s1 + $0x640] sm:$0xf]  ;;  %v3517_v20 = vor.u32 %v4402_v13, %v3516_v12  ;;  %1805 = vmatpush.bf16.msra.mxu1 %v3261_v19  ;;  %v3870_v11 = vld [vmem:[%s6727_s1 + $0x720] sm:$0xf0]  ;;  %v3617_v19 = vor.u32 %v4422_v7, %v3614_v9  ;;  %v4323_v9 = vld [vmem:[%s6727_s1 + $0x1e4] sm:$0xf0] }
  0x42   : > { %v4466_v15 = vld [vmem:[%s6727_s1 + $0x65c] sm:$0xf0]  ;;  %v4286_v12 = vld [vmem:[%s6727_s1 + $0xc4] sm:$0xf] }
  0x43   : > { %v2972_v17 = vld [vmem:[%s6727_s1] sm:$0xf]  ;;  %v3773_v24 = vor.u32 %v4466_v15, %v3772_v14  ;;  %1819 = vmatpush.bf16.msra.mxu2 %v3517_v20  ;;  %v3070_v13 = vld [vmem:[%s6727_s1 + $0xe0] sm:$0xf0]  ;;  %v3105_v14 = vor.u32 %v4294_v1, %v3102_v2 }
  0x44   : > { %v4266_v18 = vld [vmem:[%s6727_s1 + $0x1c] sm:$0xf0]  ;;  %v4350_v15 = vld [vmem:[%s6727_s1 + $0x2c4] sm:$0xf] }
  0x45   : > { %v3228_v21 = vld [vmem:[%s6727_s1 + $0x200] sm:$0xf]  ;;  %v2973_v31 = vor.u32 %v4266_v18, %v2972_v17  ;;  %1833 = vmatpush.bf16.msra.mxu3 %v3773_v24  ;;  %v3326_v16 = vld [vmem:[%s6727_s1 + $0x2e0] sm:$0xf0]  ;;  %v3361_v18 = vor.u32 %v4358_v5, %v3358_v6  ;;  %v2964_v24 = vld [vmem:[%s219_s24 + $0x8] sm:$0xf] }
  0x46   : > { %v4330_v22 = vld [vmem:[%s6727_s1 + $0x21c] sm:$0xf0]  ;;  %v4414_v17 = vld [vmem:[%s6727_s1 + $0x4c4] sm:$0xf] }
  0x47   : > { %v3484_v23 = vld [vmem:[%s6727_s1 + $0x400] sm:$0xf]  ;;  %v3229_v35 = vor.u32 %v4330_v22, %v3228_v21  ;;  %1792 = vmatpush.bf16.msra.mxu0 %v2973_v31  ;;  %v3582_v20 = vld [vmem:[%s6727_s1 + $0x4e0] sm:$0xf0]  ;;  %v3073_v31 = vor.u32 %v4286_v12, %v3070_v13  ;;  %v4387_v12 = vld [vmem:[%s6727_s1 + $0x3e4] sm:$0xf0] }
  0x48   : > { %v4394_v25 = vld [vmem:[%s6727_s1 + $0x41c] sm:$0xf0]  ;;  %v4478_v21 = vld [vmem:[%s6727_s1 + $0x6c4] sm:$0xf]  ;;  %v3585_v37 = vor.u32 %v4414_v17, %v3582_v20  ;;  %v3716_v13 = vld [vmem:[%s6727_s1 + $0x5c8] sm:$0xf] }
  0x49   : > { %v3740_v26 = vld [vmem:[%s6727_s1 + $0x600] sm:$0xf]  ;;  %v3485_v36 = vor.u32 %v4394_v25, %v3484_v23  ;;  %1806 = vmatpush.bf16.msra.mxu1 %v3229_v35  ;;  %v3838_v22 = vld [vmem:[%s6727_s1 + $0x6e0] sm:$0xf0]  ;;  %v3873_v23 = vor.u32 %v4486_v10, %v3870_v11  ;;  %v4261_v25 = vld [vmem:[%s219_s24 + $0x14] sm:$0xf0] }
  0x4a   : > { %v4458_v27 = vld [vmem:[%s6727_s1 + $0x61c] sm:$0xf0]  ;;  %v2958_v35 = vld [vmem:[%s219_s24 + $0x10] sm:$0xf0]  ;;  %v4278_v38 = vld [vmem:[%s6727_s1 + $0x84] sm:$0xf] }
  0x4b   : > { %v3741_v39 = vor.u32 %v4458_v27, %v3740_v26  ;;  %1820 = vmatpush.bf16.msra.mxu2 %v3485_v36  ;;  %1841 = vmatpush.bf16.msrb.mxu0 %v3201_v40  ;;  %v4259_v26 = vld [vmem:[%s219_s24 + $0xc] sm:$0xf]  ;;  %v4993_v27 = vor.u32 %v4261_v25, %v2964_v24  ;;  %v2956_v29 = vld [vmem:[%s219_s24] sm:$0xf]  ;;  %v3329_v36 = vor.u32 %v4350_v15, %v3326_v16  ;;  %v4342_v40 = vld [vmem:[%s6727_s1 + $0x284] sm:$0xf] }
  0x4c   : > { %v4995_v32 = vor.u32 %v4259_v26, %v2966_v28  ;;  %v4997_v33 = vor.u32 %v4260_v30, %v2956_v29  ;;  %v3294_v43 = vld [vmem:[%s6727_s1 + $0x2a0] sm:$0xf0]  ;;  %v3460_v10 = vld [vmem:[%s6727_s1 + $0x3c8] sm:$0xf] }
  0x4d   : > { %1834 = vmatpush.bf16.msra.mxu3 %v3741_v39  ;;  %1855 = vmatpush.bf16.msrb.mxu1 %v3457_v41  ;;  %v3038_v39 = vld [vmem:[%s6727_s1 + $0xa0] sm:$0xf0]  ;;  %v5008_v41 = vor.u32 %v4258_v34, %v2958_v35  ;;  %v3297_v49 = vor.u32 %v4342_v40, %v3294_v43  ;;  %v3972_v17 = vld [vmem:[%s6727_s1 + $0x7c8] sm:$0xf] }
  0x4e   : > { %v4406_v44 = vld [vmem:[%s6727_s1 + $0x484] sm:$0xf]  ;;  %1821 = vmatmul.bf16.vlgmr.msra.gmra.mxu2 %v4993_v27  ;;  %1793 = vmatmul.bf16.vlgmr.msra.gmra.mxu0 %v4997_v33  ;;  %v3041_v48 = vor.u32 %v4278_v38, %v3038_v39  ;;  %v4315_v24 = vld [vmem:[%s6727_s1 + $0x1a4] sm:$0xf0] }
  0x4f   : > { %1869 = vmatpush.bf16.msrb.mxu2 %v3713_v42  ;;  %1842 = vmatpush.bf16.msrb.mxu0 %v3169_v52  ;;  %v3841_v42 = vor.u32 %v4478_v21, %v3838_v22  ;;  %v3550_v45 = vld [vmem:[%s6727_s1 + $0x4a0] sm:$0xf0]  ;;  %v3461_v21 = vor.u32 %v4387_v12, %v3460_v10  ;;  %v3428_v25 = vld [vmem:[%s6727_s1 + $0x388] sm:$0xf] }
  0x50   : > { %v3806_v47 = vld [vmem:[%s6727_s1 + $0x6a0] sm:$0xf0]  ;;  %1835 = vmatmul.bf16.vlgmr.msra.gmra.mxu3 %v4995_v32  ;;  %1807 = vmatmul.bf16.vlgmr.msra.gmra.mxu1 %v5008_v41  ;;  %v3553_v50 = vor.u32 %v4406_v44, %v3550_v45  ;;  %v4379_v28 = vld [vmem:[%s6727_s1 + $0x3a4] sm:$0xf0] }
  0x51   : > { %1883 = vmatpush.bf16.msrb.mxu3 %v3969_v46  ;;  %1856 = vmatpush.bf16.msrb.mxu1 %v3425_v53  ;;  %v4470_v46 = vld [vmem:[%s6727_s1 + $0x684] sm:$0xf]  ;;  %v3684_v29 = vld [vmem:[%s6727_s1 + $0x588] sm:$0xf] }
  0x52   : > { %v4270_v51 = vld [vmem:[%s6727_s1 + $0x44] sm:$0xf]  ;;  %v4443_v30 = vld [vmem:[%s6727_s1 + $0x5a4] sm:$0xf0] }
  0x53   : > { %1870 = vmatpush.bf16.msrb.mxu2 %v3681_v54  ;;  %1843 = vmatpush.bf16.msrb.mxu0 %v3137_v0  ;;  %v3006_v52 = vld [vmem:[%s6727_s1 + $0x60] sm:$0xf0]  ;;  %v3809_v54 = vor.u32 %v4470_v46, %v3806_v47  ;;  %v4507_v34 = vld [vmem:[%s6727_s1 + $0x7a4] sm:$0xf0] }
  0x54   : > { %v4334_v53 = vld [vmem:[%s6727_s1 + $0x244] sm:$0xf]  ;;  %v3009_v60 = vor.u32 %v4270_v51, %v3006_v52  ;;  %v3140_v38 = vld [vmem:[%s6727_s1 + $0x148] sm:$0xf] }
  0x55   : > { %1884 = vmatpush.bf16.msrb.mxu3 %v3937_v58  ;;  %1857 = vmatpush.bf16.msrb.mxu1 %v3393_v3  ;;  %v3262_v55 = vld [vmem:[%s6727_s1 + $0x260] sm:$0xf0]  ;;  %v4307_v39 = vld [vmem:[%s6727_s1 + $0x164] sm:$0xf0] }
  0x56   : > { %v4398_v56 = vld [vmem:[%s6727_s1 + $0x444] sm:$0xf]  ;;  %v3265_v63 = vor.u32 %v4334_v53, %v3262_v55  ;;  %v3396_v40 = vld [vmem:[%s6727_s1 + $0x348] sm:$0xf] }
  0x57   : > { %1871 = vmatpush.bf16.msrb.mxu2 %v3649_v4  ;;  %1844 = vmatpush.bf16.msrb.mxu0 %v3105_v14  ;;  %v3518_v57 = vld [vmem:[%s6727_s1 + $0x460] sm:$0xf0]  ;;  %v4451_v14 = vld [vmem:[%s6727_s1 + $0x5e4] sm:$0xf0] }
  0x58   : > { %v4462_v58 = vld [vmem:[%s6727_s1 + $0x644] sm:$0xf]  ;;  %v3521_v0 = vor.u32 %v4398_v56, %v3518_v57  ;;  %v3717_v22 = vor.u32 %v4451_v14, %v3716_v13  ;;  %v4371_v43 = vld [vmem:[%s6727_s1 + $0x364] sm:$0xf0] }
  0x59   : > { %1885 = vmatpush.bf16.msrb.mxu3 %v3905_v8  ;;  %1858 = vmatpush.bf16.msrb.mxu1 %v3361_v18  ;;  %v3774_v59 = vld [vmem:[%s6727_s1 + $0x660] sm:$0xf0]  ;;  %v3204_v8 = vld [vmem:[%s6727_s1 + $0x1c8] sm:$0xf] }
  0x5a   : > { %v4262_v61 = vld [vmem:[%s6727_s1 + $0x4] sm:$0xf]  ;;  %v3777_v4 = vor.u32 %v4462_v58, %v3774_v59  ;;  %v4515_v18 = vld [vmem:[%s6727_s1 + $0x7e4] sm:$0xf0]  ;;  %v3205_v20 = vor.u32 %v4323_v9, %v3204_v8 }
  0x5b   : > { %1872 = vmatpush.bf16.msrb.mxu2 %v3617_v19  ;;  %1845 = vmatpush.bf16.msrb.mxu0 %v3073_v31  ;;  %v2974_v62 = vld [vmem:[%s6727_s1 + $0x20] sm:$0xf0]  ;;  %v3973_v26 = vor.u32 %v4515_v18, %v3972_v17  ;;  %v3940_v31 = vld [vmem:[%s6727_s1 + $0x788] sm:$0xf] }
  0x5c   : > { %v4326_v1 = vld [vmem:[%s6727_s1 + $0x204] sm:$0xf]  ;;  %v2977_v11 = vor.u32 %v4262_v61, %v2974_v62  ;;  %v3652_v44 = vld [vmem:[%s6727_s1 + $0x548] sm:$0xf] }
  0x5d   : > { %1886 = vmatpush.bf16.msrb.mxu3 %v3873_v23  ;;  %1859 = vmatpush.bf16.msrb.mxu1 %v3329_v36  ;;  %v3230_v2 = vld [vmem:[%s6727_s1 + $0x220] sm:$0xf0]  ;;  %v3172_v23 = vld [vmem:[%s6727_s1 + $0x188] sm:$0xf]  ;;  %v3429_v36 = vor.u32 %v4379_v28, %v3428_v25 }
  0x5e   : > { %v4390_v3 = vld [vmem:[%s6727_s1 + $0x404] sm:$0xf]  ;;  %v3233_v15 = vor.u32 %v4326_v1, %v3230_v2  ;;  %v3173_v35 = vor.u32 %v4315_v24, %v3172_v23  ;;  %v4435_v45 = vld [vmem:[%s6727_s1 + $0x564] sm:$0xf0] }
  0x5f   : > { %1873 = vmatpush.bf16.msrb.mxu2 %v3585_v37  ;;  %1846 = vmatpush.bf16.msrb.mxu0 %v3041_v48  ;;  %v3486_v5 = vld [vmem:[%s6727_s1 + $0x420] sm:$0xf0]  ;;  %v3685_v37 = vor.u32 %v4443_v30, %v3684_v29  ;;  %v3908_v46 = vld [vmem:[%s6727_s1 + $0x748] sm:$0xf]  ;;  %v3141_v48 = vor.u32 %v4307_v39, %v3140_v38 }
  0x60   : > { %v4454_v6 = vld [vmem:[%s6727_s1 + $0x604] sm:$0xf]  ;;  %v3489_v16 = vor.u32 %v4390_v3, %v3486_v5  ;;  %v4499_v47 = vld [vmem:[%s6727_s1 + $0x764] sm:$0xf0] }
  0x61   : > { %1887 = vmatpush.bf16.msrb.mxu3 %v3841_v42  ;;  %1860 = vmatpush.bf16.msrb.mxu1 %v3297_v49  ;;  %v3742_v7 = vld [vmem:[%s6727_s1 + $0x620] sm:$0xf0]  ;;  %v3941_v42 = vor.u32 %v4507_v34, %v3940_v31  ;;  %v3397_v49 = vor.u32 %v4371_v43, %v3396_v40  ;;  %v3108_v51 = vld [vmem:[%s6727_s1 + $0x108] sm:$0xf] }
  0x62   : > { %v3745_v19 = vor.u32 %v4454_v6, %v3742_v7  ;;  %v4299_v52 = vld [vmem:[%s6727_s1 + $0x124] sm:$0xf0] }
  0x63   : > { %1874 = vmatpush.bf16.msrb.mxu2 %v3553_v50  ;;  %1847 = vmatpush.bf16.msrb.mxu0 %v3009_v60  ;;  %v3653_v50 = vor.u32 %v4435_v45, %v3652_v44  ;;  %v3364_v53 = vld [vmem:[%s6727_s1 + $0x308] sm:$0xf]  ;;  %v3109_v60 = vor.u32 %v4299_v52, %v3108_v51  ;;  %v3462_v52 = vld [vmem:[%s6727_s1 + $0x3e8] sm:$0xf0] }
  0x64   : > { %v4363_v55 = vld [vmem:[%s6727_s1 + $0x324] sm:$0xf0] }
  0x65   : > { %1888 = vmatpush.bf16.msrb.mxu3 %v3809_v54  ;;  %1861 = vmatpush.bf16.msrb.mxu1 %v3265_v63  ;;  %v3909_v54 = vor.u32 %v4499_v47, %v3908_v46  ;;  %v3620_v56 = vld [vmem:[%s6727_s1 + $0x508] sm:$0xf]  ;;  %v3365_v61 = vor.u32 %v4363_v55, %v3364_v53  ;;  %v4447_v53 = vld [vmem:[%s6727_s1 + $0x5cc] sm:$0xf] }
  0x66   : > { %v4427_v57 = vld [vmem:[%s6727_s1 + $0x524] sm:$0xf0] }
  0x67   : > { %1875 = vmatpush.bf16.msrb.mxu2 %v3521_v0  ;;  %1848 = vmatpush.bf16.msrb.mxu0 %v2977_v11  ;;  %v3876_v58 = vld [vmem:[%s6727_s1 + $0x708] sm:$0xf]  ;;  %v3621_v62 = vor.u32 %v4427_v57, %v3620_v56  ;;  %v4511_v57 = vld [vmem:[%s6727_s1 + $0x7cc] sm:$0xf] }
  0x68   : > { %v4491_v59 = vld [vmem:[%s6727_s1 + $0x724] sm:$0xf0] }
  0x69   : > { %1889 = vmatpush.bf16.msrb.mxu3 %v3777_v4  ;;  %1862 = vmatpush.bf16.msrb.mxu1 %v3233_v15  ;;  %v3076_v63 = vld [vmem:[%s6727_s1 + $0xc8] sm:$0xf]  ;;  %v3877_v2 = vor.u32 %v4491_v59, %v3876_v58  ;;  %v3974_v58 = vld [vmem:[%s6727_s1 + $0x7e8] sm:$0xf0] }
  0x6a   : > { %1849 = vmatmul.bf16.vlgmr.msrb.gmra.mxu0 %v4997_v33  ;;  %v4291_v0 = vld [vmem:[%s6727_s1 + $0xe4] sm:$0xf0] }
  0x6b   : > { %1876 = vmatpush.bf16.msrb.mxu2 %v3489_v16  ;;  %1897 = vmatpush.bf16.msra.mxu0 %v3205_v20  ;;  %v3332_v1 = vld [vmem:[%s6727_s1 + $0x2c8] sm:$0xf]  ;;  %v3077_v8 = vor.u32 %v4291_v0, %v3076_v63  ;;  %v4311_v63 = vld [vmem:[%s6727_s1 + $0x18c] sm:$0xf] }
  0x6c   : > { %1863 = vmatmul.bf16.vlgmr.msrb.gmra.mxu1 %v5008_v41  ;;  %v4355_v3 = vld [vmem:[%s6727_s1 + $0x2e4] sm:$0xf0]  ;;  %v3174_v0 = vld [vmem:[%s6727_s1 + $0x1a8] sm:$0xf0] }
  0x6d   : > { %1890 = vmatpush.bf16.msrb.mxu3 %v3745_v19  ;;  %1911 = vmatpush.bf16.msra.mxu1 %v3461_v21  ;;  %v3588_v4 = vld [vmem:[%s6727_s1 + $0x4c8] sm:$0xf]  ;;  %v3333_v9 = vor.u32 %v4355_v3, %v3332_v1  ;;  %v4375_v1 = vld [vmem:[%s6727_s1 + $0x38c] sm:$0xf] }
  0x6e   : > { %1877 = vmatmul.bf16.vlgmr.msrb.gmra.mxu2 %v4993_v27  ;;  %v4419_v5 = vld [vmem:[%s6727_s1 + $0x4e4] sm:$0xf0]  ;;  %v3430_v3 = vld [vmem:[%s6727_s1 + $0x3a8] sm:$0xf0] }
  0x6f   : > { %1925 = vmatpush.bf16.msra.mxu2 %v3717_v22  ;;  %1898 = vmatpush.bf16.msra.mxu0 %v3173_v35  ;;  %v3844_v6 = vld [vmem:[%s6727_s1 + $0x6c8] sm:$0xf]  ;;  %v3589_v10 = vor.u32 %v4419_v5, %v3588_v4  ;;  %v4439_v4 = vld [vmem:[%s6727_s1 + $0x58c] sm:$0xf] }
  0x70   : > { %1891 = vmatmul.bf16.vlgmr.msrb.gmra.mxu3 %v4995_v32  ;;  %v4483_v7 = vld [vmem:[%s6727_s1 + $0x6e4] sm:$0xf0]  ;;  %v3686_v5 = vld [vmem:[%s6727_s1 + $0x5a8] sm:$0xf0] }
  0x71   : > { %1939 = vmatpush.bf16.msra.mxu3 %v3973_v26  ;;  %1912 = vmatpush.bf16.msra.mxu1 %v3429_v36  ;;  %v3044_v11 = vld [vmem:[%s6727_s1 + $0x88] sm:$0xf]  ;;  %v3845_v14 = vor.u32 %v4483_v7, %v3844_v6  ;;  %v4503_v6 = vld [vmem:[%s6727_s1 + $0x78c] sm:$0xf] }
  0x72   : > { %v4283_v12 = vld [vmem:[%s6727_s1 + $0xa4] sm:$0xf0]  ;;  %v3942_v7 = vld [vmem:[%s6727_s1 + $0x7a8] sm:$0xf0] }
  0x73   : > { %1926 = vmatpush.bf16.msra.mxu2 %v3685_v37  ;;  %1899 = vmatpush.bf16.msra.mxu0 %v3141_v48  ;;  %v3300_v13 = vld [vmem:[%s6727_s1 + $0x288] sm:$0xf]  ;;  %v3045_v20 = vor.u32 %v4283_v12, %v3044_v11  ;;  %v4319_v48 = vld [vmem:[%s6727_s1 + $0x1cc] sm:$0xf] }
  0x74   : > { %v4347_v15 = vld [vmem:[%s6727_s1 + $0x2a4] sm:$0xf0]  ;;  %v4303_v11 = vld [vmem:[%s6727_s1 + $0x14c] sm:$0xf] }
  0x75   : > { %1940 = vmatpush.bf16.msra.mxu3 %v3941_v42  ;;  %1913 = vmatpush.bf16.msra.mxu1 %v3397_v49  ;;  %v3556_v16 = vld [vmem:[%s6727_s1 + $0x488] sm:$0xf]  ;;  %v3301_v21 = vor.u32 %v4347_v15, %v3300_v13  ;;  %v3206_v49 = vld [vmem:[%s6727_s1 + $0x1e8] sm:$0xf0] }
  0x76   : > { %v4411_v17 = vld [vmem:[%s6727_s1 + $0x4a4] sm:$0xf0]  ;;  %v3142_v12 = vld [vmem:[%s6727_s1 + $0x168] sm:$0xf0] }
  0x77   : > { %1927 = vmatpush.bf16.msra.mxu2 %v3653_v50  ;;  %1900 = vmatpush.bf16.msra.mxu0 %v3109_v60  ;;  %v3812_v18 = vld [vmem:[%s6727_s1 + $0x688] sm:$0xf]  ;;  %v3557_v22 = vor.u32 %v4411_v17, %v3556_v16  ;;  %v4383_v50 = vld [vmem:[%s6727_s1 + $0x3cc] sm:$0xf]  ;;  %v3209_v60 = vor.u32 %v4319_v48, %v3206_v49 }
  0x78   : > { %v4475_v19 = vld [vmem:[%s6727_s1 + $0x6a4] sm:$0xf0]  ;;  %v4367_v13 = vld [vmem:[%s6727_s1 + $0x34c] sm:$0xf] }
  0x79   : > { %1941 = vmatpush.bf16.msra.mxu3 %v3909_v54  ;;  %1914 = vmatpush.bf16.msra.mxu1 %v3365_v61  ;;  %v3012_v23 = vld [vmem:[%s6727_s1 + $0x48] sm:$0xf]  ;;  %v3813_v26 = vor.u32 %v4475_v19, %v3812_v18  ;;  %v3718_v54 = vld [vmem:[%s6727_s1 + $0x5e8] sm:$0xf0]  ;;  %v3465_v61 = vor.u32 %v4383_v50, %v3462_v52 }
  0x7a   : > { %v4275_v24 = vld [vmem:[%s6727_s1 + $0x64] sm:$0xf0]  ;;  %v3398_v15 = vld [vmem:[%s6727_s1 + $0x368] sm:$0xf0] }
  0x7b   : > { %1928 = vmatpush.bf16.msra.mxu2 %v3621_v62  ;;  %1901 = vmatpush.bf16.msra.mxu0 %v3077_v8  ;;  %v3268_v25 = vld [vmem:[%s6727_s1 + $0x248] sm:$0xf]  ;;  %v3013_v35 = vor.u32 %v4275_v24, %v3012_v23  ;;  %v3721_v62 = vor.u32 %v4447_v53, %v3718_v54  ;;  %v3177_v8 = vor.u32 %v4311_v63, %v3174_v0  ;;  %v4431_v16 = vld [vmem:[%s6727_s1 + $0x54c] sm:$0xf] }
  0x7c   : > { %v4339_v28 = vld [vmem:[%s6727_s1 + $0x264] sm:$0xf0]  ;;  %v3654_v17 = vld [vmem:[%s6727_s1 + $0x568] sm:$0xf0] }
  0x7d   : > { %1942 = vmatpush.bf16.msra.mxu3 %v3877_v2  ;;  %1915 = vmatpush.bf16.msra.mxu1 %v3333_v9  ;;  %v3524_v29 = vld [vmem:[%s6727_s1 + $0x448] sm:$0xf]  ;;  %v3269_v39 = vor.u32 %v4339_v28, %v3268_v25  ;;  %v3977_v2 = vor.u32 %v4511_v57, %v3974_v58  ;;  %v3433_v9 = vor.u32 %v4375_v1, %v3430_v3  ;;  %v4495_v18 = vld [vmem:[%s6727_s1 + $0x74c] sm:$0xf] }
  0x7e   : > { %v4403_v30 = vld [vmem:[%s6727_s1 + $0x464] sm:$0xf0]  ;;  %v3910_v19 = vld [vmem:[%s6727_s1 + $0x768] sm:$0xf0] }
  0x7f   : > { %1929 = vmatpush.bf16.msra.mxu2 %v3589_v10  ;;  %v3780_v31 = vld [vmem:[%s6727_s1 + $0x648] sm:$0xf]  ;;  %1902 = vmatpush.bf16.msra.mxu0 %v3045_v20  ;;  %v3525_v40 = vor.u32 %v4403_v30, %v3524_v29  ;;  %v3689_v10 = vor.u32 %v4439_v4, %v3686_v5  ;;  %v3145_v20 = vor.u32 %v4303_v11, %v3142_v12  ;;  %v4295_v23 = vld [vmem:[%s6727_s1 + $0x10c] sm:$0xf] }
  0x80   : > { %v4467_v34 = vld [vmem:[%s6727_s1 + $0x664] sm:$0xf0]  ;;  %v3110_v24 = vld [vmem:[%s6727_s1 + $0x128] sm:$0xf0] }
  0x81   : > { %1943 = vmatpush.bf16.msra.mxu3 %v3845_v14  ;;  %v2980_v36 = vld [vmem:[%s6727_s1 + $0x8] sm:$0xf]  ;;  %1916 = vmatpush.bf16.msra.mxu1 %v3301_v21  ;;  %v3781_v45 = vor.u32 %v4467_v34, %v3780_v31  ;;  %v3945_v14 = vor.u32 %v4503_v6, %v3942_v7  ;;  %v3401_v21 = vor.u32 %v4367_v13, %v3398_v15  ;;  %v4359_v25 = vld [vmem:[%s6727_s1 + $0x30c] sm:$0xf] }
  0x82   : > { %v4267_v37 = vld [vmem:[%s6727_s1 + $0x24] sm:$0xf0]  ;;  %v3366_v28 = vld [vmem:[%s6727_s1 + $0x328] sm:$0xf0] }
  0x83   : > { %v3236_v38 = vld [vmem:[%s6727_s1 + $0x208] sm:$0xf]  ;;  %1930 = vmatpush.bf16.msra.mxu2 %v3557_v22  ;;  %1903 = vmatpush.bf16.msra.mxu0 %v3013_v35  ;;  %v2981_v51 = vor.u32 %v4267_v37, %v2980_v36  ;;  %v3657_v22 = vor.u32 %v4431_v16, %v3654_v17  ;;  %v4423_v29 = vld [vmem:[%s6727_s1 + $0x50c] sm:$0xf]  ;;  %v3113_v35 = vor.u32 %v4295_v23, %v3110_v24  ;;  %v4388_v24 = vld [vmem:[%s6727_s1 + $0x3ec] sm:$0xf0] }
  0x84   : > { %v4331_v42 = vld [vmem:[%s6727_s1 + $0x224] sm:$0xf0]  ;;  %v3622_v30 = vld [vmem:[%s6727_s1 + $0x528] sm:$0xf0]  ;;  %v3369_v36 = vor.u32 %v4359_v25, %v3366_v28  ;;  %v3724_v25 = vld [vmem:[%s6727_s1 + $0x5d0] sm:$0xf] }
  0x85   : > { %v3492_v43 = vld [vmem:[%s6727_s1 + $0x408] sm:$0xf]  ;;  %1944 = vmatpush.bf16.msra.mxu3 %v3813_v26  ;;  %1917 = vmatpush.bf16.msra.mxu1 %v3269_v39  ;;  %v3237_v55 = vor.u32 %v4331_v42, %v3236_v38  ;;  %v3913_v26 = vor.u32 %v4495_v18, %v3910_v19  ;;  %v4487_v31 = vld [vmem:[%s6727_s1 + $0x70c] sm:$0xf]  ;;  %v3625_v37 = vor.u32 %v4423_v29, %v3622_v30  ;;  %v3980_v30 = vld [vmem:[%s6727_s1 + $0x7d0] sm:$0xf] }
  0x86   : > { %v4395_v44 = vld [vmem:[%s6727_s1 + $0x424] sm:$0xf0]  ;;  %v3878_v34 = vld [vmem:[%s6727_s1 + $0x728] sm:$0xf0] }
  0x87   : > { %v3748_v46 = vld [vmem:[%s6727_s1 + $0x608] sm:$0xf]  ;;  %1931 = vmatpush.bf16.msra.mxu2 %v3525_v40  ;;  %v3493_v56 = vor.u32 %v4395_v44, %v3492_v43  ;;  %1904 = vmatpush.bf16.msra.mxu0 %v2981_v51  ;;  %v4287_v38 = vld [vmem:[%s6727_s1 + $0xcc] sm:$0xf]  ;;  %v3881_v42 = vor.u32 %v4487_v31, %v3878_v34  ;;  %v4516_v31 = vld [vmem:[%s6727_s1 + $0x7ec] sm:$0xf0] }
  0x88   : > { %v4459_v47 = vld [vmem:[%s6727_s1 + $0x624] sm:$0xf0]  ;;  %v3078_v39 = vld [vmem:[%s6727_s1 + $0xe8] sm:$0xf0] }
  0x89   : > { %1945 = vmatpush.bf16.msra.mxu3 %v3781_v45  ;;  %v3749_v59 = vor.u32 %v4459_v47, %v3748_v46  ;;  %1918 = vmatpush.bf16.msra.mxu1 %v3237_v55  ;;  %v4351_v40 = vld [vmem:[%s6727_s1 + $0x2cc] sm:$0xf]  ;;  %v3081_v48 = vor.u32 %v4287_v38, %v3078_v39  ;;  %v3180_v38 = vld [vmem:[%s6727_s1 + $0x190] sm:$0xf] }
  0x8a   : > { %1905 = vmatmul.bf16.vlgmr.msra.gmra.mxu0 %v4997_v33  ;;  %v3334_v43 = vld [vmem:[%s6727_s1 + $0x2e8] sm:$0xf0]  ;;  %v4316_v39 = vld [vmem:[%s6727_s1 + $0x1ac] sm:$0xf0] }
  0x8b   : > { %1932 = vmatpush.bf16.msra.mxu2 %v3493_v56  ;;  %1953 = vmatpush.bf16.msrb.mxu0 %v3209_v60  ;;  %v4415_v44 = vld [vmem:[%s6727_s1 + $0x4cc] sm:$0xf]  ;;  %v3337_v49 = vor.u32 %v4351_v40, %v3334_v43  ;;  %v3436_v40 = vld [vmem:[%s6727_s1 + $0x390] sm:$0xf] }
  0x8c   : > { %1919 = vmatmul.bf16.vlgmr.msra.gmra.mxu1 %v5008_v41  ;;  %v3590_v45 = vld [vmem:[%s6727_s1 + $0x4e8] sm:$0xf0]  ;;  %v4380_v43 = vld [vmem:[%s6727_s1 + $0x3ac] sm:$0xf0] }
  0x8d   : > { %1946 = vmatpush.bf16.msra.mxu3 %v3749_v59  ;;  %1967 = vmatpush.bf16.msrb.mxu1 %v3465_v61  ;;  %v4479_v46 = vld [vmem:[%s6727_s1 + $0x6cc] sm:$0xf]  ;;  %v3593_v50 = vor.u32 %v4415_v44, %v3590_v45  ;;  %v3692_v44 = vld [vmem:[%s6727_s1 + $0x590] sm:$0xf] }
  0x8e   : > { %1933 = vmatmul.bf16.vlgmr.msra.gmra.mxu2 %v4993_v27  ;;  %v3846_v47 = vld [vmem:[%s6727_s1 + $0x6e8] sm:$0xf0]  ;;  %v4444_v45 = vld [vmem:[%s6727_s1 + $0x5ac] sm:$0xf0] }
  0x8f   : > { %1981 = vmatpush.bf16.msrb.mxu2 %v3721_v62  ;;  %1954 = vmatpush.bf16.msrb.mxu0 %v3177_v8  ;;  %v4279_v51 = vld [vmem:[%s6727_s1 + $0x8c] sm:$0xf]  ;;  %v3849_v54 = vor.u32 %v4479_v46, %v3846_v47  ;;  %v3948_v46 = vld [vmem:[%s6727_s1 + $0x790] sm:$0xf] }
  0x90   : > { %1947 = vmatmul.bf16.vlgmr.msra.gmra.mxu3 %v4995_v32  ;;  %v3046_v52 = vld [vmem:[%s6727_s1 + $0xa8] sm:$0xf0]  ;;  %v4508_v47 = vld [vmem:[%s6727_s1 + $0x7ac] sm:$0xf0] }
  0x91   : > { %1995 = vmatpush.bf16.msrb.mxu3 %v3977_v2  ;;  %1968 = vmatpush.bf16.msrb.mxu1 %v3433_v9  ;;  %v4343_v53 = vld [vmem:[%s6727_s1 + $0x28c] sm:$0xf]  ;;  %v3049_v60 = vor.u32 %v4279_v51, %v3046_v52  ;;  %v3148_v51 = vld [vmem:[%s6727_s1 + $0x150] sm:$0xf] }
  0x92   : > { %v3302_v55 = vld [vmem:[%s6727_s1 + $0x2a8] sm:$0xf0]  ;;  %v4308_v52 = vld [vmem:[%s6727_s1 + $0x16c] sm:$0xf0] }
  0x93   : > { %1982 = vmatpush.bf16.msrb.mxu2 %v3689_v10  ;;  %1955 = vmatpush.bf16.msrb.mxu0 %v3145_v20  ;;  %v4407_v56 = vld [vmem:[%s6727_s1 + $0x48c] sm:$0xf]  ;;  %v3305_v61 = vor.u32 %v4343_v53, %v3302_v55  ;;  %v3212_v20 = vld [vmem:[%s6727_s1 + $0x1d0] sm:$0xf] }
  0x94   : > { %v3558_v57 = vld [vmem:[%s6727_s1 + $0x4a8] sm:$0xf0]  ;;  %v3404_v53 = vld [vmem:[%s6727_s1 + $0x350] sm:$0xf] }
  0x95   : > { %1996 = vmatpush.bf16.msrb.mxu3 %v3945_v14  ;;  %1969 = vmatpush.bf16.msrb.mxu1 %v3401_v21  ;;  %v4471_v58 = vld [vmem:[%s6727_s1 + $0x68c] sm:$0xf]  ;;  %v3561_v62 = vor.u32 %v4407_v56, %v3558_v57  ;;  %v4324_v21 = vld [vmem:[%s6727_s1 + $0x1ec] sm:$0xf0] }
  0x96   : > { %v3814_v59 = vld [vmem:[%s6727_s1 + $0x6a8] sm:$0xf0]  ;;  %v4372_v55 = vld [vmem:[%s6727_s1 + $0x36c] sm:$0xf0] }
  0x97   : > { %1983 = vmatpush.bf16.msrb.mxu2 %v3657_v22  ;;  %1956 = vmatpush.bf16.msrb.mxu0 %v3113_v35  ;;  %v4271_v63 = vld [vmem:[%s6727_s1 + $0x4c] sm:$0xf]  ;;  %v3817_v2 = vor.u32 %v4471_v58, %v3814_v59  ;;  %v3468_v22 = vld [vmem:[%s6727_s1 + $0x3d0] sm:$0xf]  ;;  %v3213_v35 = vor.u32 %v4324_v21, %v3212_v20 }
  0x98   : > { %v3014_v0 = vld [vmem:[%s6727_s1 + $0x68] sm:$0xf0]  ;;  %v3660_v56 = vld [vmem:[%s6727_s1 + $0x550] sm:$0xf] }
  0x99   : > { %1997 = vmatpush.bf16.msrb.mxu3 %v3913_v26  ;;  %1970 = vmatpush.bf16.msrb.mxu1 %v3369_v36  ;;  %v4335_v1 = vld [vmem:[%s6727_s1 + $0x24c] sm:$0xf]  ;;  %v3017_v8 = vor.u32 %v4271_v63, %v3014_v0  ;;  %v4452_v26 = vld [vmem:[%s6727_s1 + $0x5ec] sm:$0xf0]  ;;  %v3469_v36 = vor.u32 %v4388_v24, %v3468_v22 }
  0x9a   : > { %v3270_v3 = vld [vmem:[%s6727_s1 + $0x268] sm:$0xf0]  ;;  %v4436_v57 = vld [vmem:[%s6727_s1 + $0x56c] sm:$0xf0] }
  0x9b   : > { %1984 = vmatpush.bf16.msrb.mxu2 %v3625_v37  ;;  %1957 = vmatpush.bf16.msrb.mxu0 %v3081_v48  ;;  %v4399_v4 = vld [vmem:[%s6727_s1 + $0x44c] sm:$0xf]  ;;  %v3273_v11 = vor.u32 %v4335_v1, %v3270_v3  ;;  %v3725_v37 = vor.u32 %v4452_v26, %v3724_v25  ;;  %v3181_v48 = vor.u32 %v4316_v39, %v3180_v38  ;;  %v3916_v58 = vld [vmem:[%s6727_s1 + $0x750] sm:$0xf] }
  0x9c   : > { %v3526_v5 = vld [vmem:[%s6727_s1 + $0x468] sm:$0xf0]  ;;  %v4500_v59 = vld [vmem:[%s6727_s1 + $0x76c] sm:$0xf0] }
  0x9d   : > { %1998 = vmatpush.bf16.msrb.mxu3 %v3881_v42  ;;  %1971 = vmatpush.bf16.msrb.mxu1 %v3337_v49  ;;  %v4463_v6 = vld [vmem:[%s6727_s1 + $0x64c] sm:$0xf]  ;;  %v3529_v12 = vor.u32 %v4399_v4, %v3526_v5  ;;  %v3981_v42 = vor.u32 %v4516_v31, %v3980_v30  ;;  %v3437_v49 = vor.u32 %v4380_v43, %v3436_v40  ;;  %v3116_v63 = vld [vmem:[%s6727_s1 + $0x110] sm:$0xf] }
  0x9e   : > { %v3782_v7 = vld [vmem:[%s6727_s1 + $0x668] sm:$0xf0]  ;;  %v4300_v0 = vld [vmem:[%s6727_s1 + $0x12c] sm:$0xf0] }
  0x9f   : > { %1985 = vmatpush.bf16.msrb.mxu2 %v3593_v50  ;;  %1958 = vmatpush.bf16.msrb.mxu0 %v3049_v60  ;;  %v4263_v9 = vld [vmem:[%s6727_s1 + $0xc] sm:$0xf]  ;;  %v3785_v16 = vor.u32 %v4463_v6, %v3782_v7  ;;  %v3693_v50 = vor.u32 %v4444_v45, %v3692_v44  ;;  %v3149_v60 = vor.u32 %v4308_v52, %v3148_v51  ;;  %v3372_v1 = vld [vmem:[%s6727_s1 + $0x310] sm:$0xf] }
  0xa0   : > { %v2982_v10 = vld [vmem:[%s6727_s1 + $0x28] sm:$0xf0]  ;;  %v4364_v3 = vld [vmem:[%s6727_s1 + $0x32c] sm:$0xf0] }
  0xa1   : > { %1999 = vmatpush.bf16.msrb.mxu3 %v3849_v54  ;;  %1972 = vmatpush.bf16.msrb.mxu1 %v3305_v61  ;;  %v4327_v13 = vld [vmem:[%s6727_s1 + $0x20c] sm:$0xf]  ;;  %v2985_v23 = vor.u32 %v4263_v9, %v2982_v10  ;;  %v3949_v54 = vor.u32 %v4508_v47, %v3948_v46  ;;  %v3405_v61 = vor.u32 %v4372_v55, %v3404_v53  ;;  %v3628_v4 = vld [vmem:[%s6727_s1 + $0x510] sm:$0xf] }
  0xa2   : > { %v3238_v14 = vld [vmem:[%s6727_s1 + $0x228] sm:$0xf0]  ;;  %v4428_v5 = vld [vmem:[%s6727_s1 + $0x52c] sm:$0xf0]  ;;  %v3373_v9 = vor.u32 %v4364_v3, %v3372_v1  ;;  %v4448_v1 = vld [vmem:[%s6727_s1 + $0x5d4] sm:$0xf] }
  0xa3   : > { %1986 = vmatpush.bf16.msrb.mxu2 %v3561_v62  ;;  %v4391_v15 = vld [vmem:[%s6727_s1 + $0x40c] sm:$0xf]  ;;  %1959 = vmatpush.bf16.msrb.mxu0 %v3017_v8  ;;  %v3241_v28 = vor.u32 %v4327_v13, %v3238_v14  ;;  %v3661_v62 = vor.u32 %v4436_v57, %v3660_v56  ;;  %v3884_v6 = vld [vmem:[%s6727_s1 + $0x710] sm:$0xf]  ;;  %v3117_v8 = vor.u32 %v4300_v0, %v3116_v63  ;;  %v3470_v0 = vld [vmem:[%s6727_s1 + $0x3f0] sm:$0xf0] }
  0xa4   : > { %v3494_v17 = vld [vmem:[%s6727_s1 + $0x428] sm:$0xf0]  ;;  %v4492_v7 = vld [vmem:[%s6727_s1 + $0x72c] sm:$0xf0]  ;;  %v3629_v10 = vor.u32 %v4428_v5, %v3628_v4  ;;  %v4512_v5 = vld [vmem:[%s6727_s1 + $0x7d4] sm:$0xf] }
  0xa5   : > { %2000 = vmatpush.bf16.msrb.mxu3 %v3817_v2  ;;  %v4455_v18 = vld [vmem:[%s6727_s1 + $0x60c] sm:$0xf]  ;;  %1973 = vmatpush.bf16.msrb.mxu1 %v3273_v11  ;;  %v3497_v29 = vor.u32 %v4391_v15, %v3494_v17  ;;  %v3917_v2 = vor.u32 %v4500_v59, %v3916_v58  ;;  %v3084_v11 = vld [vmem:[%s6727_s1 + $0xd0] sm:$0xf]  ;;  %v3885_v14 = vor.u32 %v4492_v7, %v3884_v6  ;;  %v3982_v6 = vld [vmem:[%s6727_s1 + $0x7f0] sm:$0xf0] }
  0xa6   : > { %v3750_v19 = vld [vmem:[%s6727_s1 + $0x628] sm:$0xf0]  ;;  %v3340_v13 = vld [vmem:[%s6727_s1 + $0x2d0] sm:$0xf] }
  0xa7   : > { %1987 = vmatpush.bf16.msrb.mxu2 %v3529_v12  ;;  %v3753_v34 = vor.u32 %v4455_v18, %v3750_v19  ;;  %1960 = vmatpush.bf16.msrb.mxu0 %v2985_v23  ;;  %v4292_v12 = vld [vmem:[%s6727_s1 + $0xec] sm:$0xf0] }
  0xa8   : > { %v4356_v15 = vld [vmem:[%s6727_s1 + $0x2ec] sm:$0xf0]  ;;  %v3085_v20 = vor.u32 %v4292_v12, %v3084_v11  ;;  %v4312_v11 = vld [vmem:[%s6727_s1 + $0x194] sm:$0xf] }
  0xa9   : > { %2001 = vmatpush.bf16.msrb.mxu3 %v3785_v16  ;;  %1974 = vmatpush.bf16.msrb.mxu1 %v3241_v28  ;;  %v3596_v16 = vld [vmem:[%s6727_s1 + $0x4d0] sm:$0xf]  ;;  %v3341_v21 = vor.u32 %v4356_v15, %v3340_v13  ;;  %v3182_v12 = vld [vmem:[%s6727_s1 + $0x1b0] sm:$0xf0] }
  0xaa   : > { %1961 = vmatmul.bf16.vlgmr.msrb.gmra.mxu0 %v4997_v33  ;;  %v4420_v17 = vld [vmem:[%s6727_s1 + $0x4ec] sm:$0xf0]  ;;  %v4376_v13 = vld [vmem:[%s6727_s1 + $0x394] sm:$0xf] }
  0xab   : > { %1988 = vmatpush.bf16.msrb.mxu2 %v3497_v29  ;;  %2009 = vmatpush.bf16.msra.mxu0 %v3213_v35  ;;  %v3852_v18 = vld [vmem:[%s6727_s1 + $0x6d0] sm:$0xf]  ;;  %v3597_v22 = vor.u32 %v4420_v17, %v3596_v16  ;;  %v3438_v15 = vld [vmem:[%s6727_s1 + $0x3b0] sm:$0xf0] }
  0xac   : > { %1975 = vmatmul.bf16.vlgmr.msrb.gmra.mxu1 %v5008_v41  ;;  %v4484_v19 = vld [vmem:[%s6727_s1 + $0x6ec] sm:$0xf0]  ;;  %v4440_v16 = vld [vmem:[%s6727_s1 + $0x594] sm:$0xf] }
  0xad   : > { %2002 = vmatpush.bf16.msrb.mxu3 %v3753_v34  ;;  %2023 = vmatpush.bf16.msra.mxu1 %v3469_v36  ;;  %v3052_v23 = vld [vmem:[%s6727_s1 + $0x90] sm:$0xf]  ;;  %v3853_v26 = vor.u32 %v4484_v19, %v3852_v18  ;;  %v3694_v17 = vld [vmem:[%s6727_s1 + $0x5b0] sm:$0xf0] }
  0xae   : > { %1989 = vmatmul.bf16.vlgmr.msrb.gmra.mxu2 %v4993_v27  ;;  %v4284_v24 = vld [vmem:[%s6727_s1 + $0xac] sm:$0xf0]  ;;  %v4504_v18 = vld [vmem:[%s6727_s1 + $0x794] sm:$0xf] }
  0xaf   : > { %2037 = vmatpush.bf16.msra.mxu2 %v3725_v37  ;;  %2010 = vmatpush.bf16.msra.mxu0 %v3181_v48  ;;  %v3308_v25 = vld [vmem:[%s6727_s1 + $0x290] sm:$0xf]  ;;  %v3053_v35 = vor.u32 %v4284_v24, %v3052_v23  ;;  %v3950_v19 = vld [vmem:[%s6727_s1 + $0x7b0] sm:$0xf0] }
  0xb0   : > { %2003 = vmatmul.bf16.vlgmr.msrb.gmra.mxu3 %v4995_v32  ;;  %v4348_v28 = vld [vmem:[%s6727_s1 + $0x2ac] sm:$0xf0]  ;;  %v4304_v23 = vld [vmem:[%s6727_s1 + $0x154] sm:$0xf] }
  0xb1   : > { %2051 = vmatpush.bf16.msra.mxu3 %v3981_v42  ;;  %2024 = vmatpush.bf16.msra.mxu1 %v3437_v49  ;;  %v3564_v29 = vld [vmem:[%s6727_s1 + $0x490] sm:$0xf]  ;;  %v3309_v36 = vor.u32 %v4348_v28, %v3308_v25  ;;  %v3150_v24 = vld [vmem:[%s6727_s1 + $0x170] sm:$0xf0] }
  0xb2   : > { %v4412_v30 = vld [vmem:[%s6727_s1 + $0x4ac] sm:$0xf0]  ;;  %v4368_v25 = vld [vmem:[%s6727_s1 + $0x354] sm:$0xf] }
  0xb3   : > { %2038 = vmatpush.bf16.msra.mxu2 %v3693_v50  ;;  %2011 = vmatpush.bf16.msra.mxu0 %v3149_v60  ;;  %v3820_v31 = vld [vmem:[%s6727_s1 + $0x690] sm:$0xf]  ;;  %v3565_v37 = vor.u32 %v4412_v30, %v3564_v29  ;;  %v4320_v60 = vld [vmem:[%s6727_s1 + $0x1d4] sm:$0xf] }
  0xb4   : > { %v4476_v34 = vld [vmem:[%s6727_s1 + $0x6ac] sm:$0xf0]  ;;  %v3406_v28 = vld [vmem:[%s6727_s1 + $0x370] sm:$0xf0] }
  0xb5   : > { %2052 = vmatpush.bf16.msra.mxu3 %v3949_v54  ;;  %2025 = vmatpush.bf16.msra.mxu1 %v3405_v61  ;;  %v3020_v38 = vld [vmem:[%s6727_s1 + $0x50] sm:$0xf]  ;;  %v3821_v42 = vor.u32 %v4476_v34, %v3820_v31  ;;  %v3214_v61 = vld [vmem:[%s6727_s1 + $0x1f0] sm:$0xf0] }
  0xb6   : > { %v4276_v39 = vld [vmem:[%s6727_s1 + $0x6c] sm:$0xf0]  ;;  %v4432_v29 = vld [vmem:[%s6727_s1 + $0x554] sm:$0xf] }
  0xb7   : > { %2039 = vmatpush.bf16.msra.mxu2 %v3661_v62  ;;  %2012 = vmatpush.bf16.msra.mxu0 %v3117_v8  ;;  %v3276_v40 = vld [vmem:[%s6727_s1 + $0x250] sm:$0xf]  ;;  %v3021_v48 = vor.u32 %v4276_v39, %v3020_v38  ;;  %v4384_v62 = vld [vmem:[%s6727_s1 + $0x3d4] sm:$0xf]  ;;  %v3217_v8 = vor.u32 %v4320_v60, %v3214_v61 }
  0xb8   : > { %v4340_v43 = vld [vmem:[%s6727_s1 + $0x26c] sm:$0xf0]  ;;  %v3662_v30 = vld [vmem:[%s6727_s1 + $0x570] sm:$0xf0] }
  0xb9   : > { %2053 = vmatpush.bf16.msra.mxu3 %v3917_v2  ;;  %2026 = vmatpush.bf16.msra.mxu1 %v3373_v9  ;;  %v3532_v44 = vld [vmem:[%s6727_s1 + $0x450] sm:$0xf]  ;;  %v3277_v51 = vor.u32 %v4340_v43, %v3276_v40  ;;  %v3726_v2 = vld [vmem:[%s6727_s1 + $0x5f0] sm:$0xf0]  ;;  %v3473_v9 = vor.u32 %v4384_v62, %v3470_v0 }
  0xba   : > { %v4404_v45 = vld [vmem:[%s6727_s1 + $0x46c] sm:$0xf0]  ;;  %v4496_v31 = vld [vmem:[%s6727_s1 + $0x754] sm:$0xf] }
  0xbb   : > { %2040 = vmatpush.bf16.msra.mxu2 %v3629_v10  ;;  %2013 = vmatpush.bf16.msra.mxu0 %v3085_v20  ;;  %v3788_v46 = vld [vmem:[%s6727_s1 + $0x650] sm:$0xf]  ;;  %v3533_v52 = vor.u32 %v4404_v45, %v3532_v44  ;;  %v3729_v10 = vor.u32 %v4448_v1, %v3726_v2  ;;  %v3185_v20 = vor.u32 %v4312_v11, %v3182_v12  ;;  %v3918_v34 = vld [vmem:[%s6727_s1 + $0x770] sm:$0xf0] }
  0xbc   : > { %v4468_v47 = vld [vmem:[%s6727_s1 + $0x66c] sm:$0xf0]  ;;  %v4296_v38 = vld [vmem:[%s6727_s1 + $0x114] sm:$0xf] }
  0xbd   : > { %2054 = vmatpush.bf16.msra.mxu3 %v3885_v14  ;;  %2027 = vmatpush.bf16.msra.mxu1 %v3341_v21  ;;  %v2988_v49 = vld [vmem:[%s6727_s1 + $0x10] sm:$0xf]  ;;  %v3789_v56 = vor.u32 %v4468_v47, %v3788_v46  ;;  %v3985_v14 = vor.u32 %v4512_v5, %v3982_v6  ;;  %v3441_v21 = vor.u32 %v4376_v13, %v3438_v15  ;;  %v3118_v39 = vld [vmem:[%s6727_s1 + $0x130] sm:$0xf0] }
  0xbe   : > { %v4268_v50 = vld [vmem:[%s6727_s1 + $0x2c] sm:$0xf0]  ;;  %v4360_v40 = vld [vmem:[%s6727_s1 + $0x314] sm:$0xf] }
  0xbf   : > { %2041 = vmatpush.bf16.msra.mxu2 %v3597_v22  ;;  %2014 = vmatpush.bf16.msra.mxu0 %v3053_v35  ;;  %v3244_v53 = vld [vmem:[%s6727_s1 + $0x210] sm:$0xf]  ;;  %v2989_v63 = vor.u32 %v4268_v50, %v2988_v49  ;;  %v3697_v22 = vor.u32 %v4440_v16, %v3694_v17  ;;  %v3153_v35 = vor.u32 %v4304_v23, %v3150_v24  ;;  %v3374_v43 = vld [vmem:[%s6727_s1 + $0x330] sm:$0xf0] }
  0xc0   : > { %v4332_v54 = vld [vmem:[%s6727_s1 + $0x22c] sm:$0xf0]  ;;  %v4424_v44 = vld [vmem:[%s6727_s1 + $0x514] sm:$0xf]  ;;  %v3377_v49 = vor.u32 %v4360_v40, %v3374_v43  ;;  %v3476_v40 = vld [vmem:[%s6727_s1 + $0x3d8] sm:$0xf] }
  0xc1   : > { %2055 = vmatpush.bf16.msra.mxu3 %v3853_v26  ;;  %2028 = vmatpush.bf16.msra.mxu1 %v3309_v36  ;;  %v3500_v55 = vld [vmem:[%s6727_s1 + $0x410] sm:$0xf]  ;;  %v3245_v3 = vor.u32 %v4332_v54, %v3244_v53  ;;  %v3953_v26 = vor.u32 %v4504_v18, %v3950_v19  ;;  %v3409_v36 = vor.u32 %v4368_v25, %v3406_v28  ;;  %v3630_v45 = vld [vmem:[%s6727_s1 + $0x530] sm:$0xf0]  ;;  %v4389_v43 = vld [vmem:[%s6727_s1 + $0x3f4] sm:$0xf0] }
  0xc2   : > { %v4396_v57 = vld [vmem:[%s6727_s1 + $0x42c] sm:$0xf0]  ;;  %v4488_v46 = vld [vmem:[%s6727_s1 + $0x714] sm:$0xf]  ;;  %v3633_v50 = vor.u32 %v4424_v44, %v3630_v45  ;;  %v3732_v44 = vld [vmem:[%s6727_s1 + $0x5d8] sm:$0xf] }
  0xc3   : > { %2042 = vmatpush.bf16.msra.mxu2 %v3565_v37  ;;  %v3756_v58 = vld [vmem:[%s6727_s1 + $0x610] sm:$0xf]  ;;  %2015 = vmatpush.bf16.msra.mxu0 %v3021_v48  ;;  %v3501_v4 = vor.u32 %v4396_v57, %v3500_v55  ;;  %v3665_v37 = vor.u32 %v4432_v29, %v3662_v30  ;;  %v3886_v47 = vld [vmem:[%s6727_s1 + $0x730] sm:$0xf0]  ;;  %v3121_v48 = vor.u32 %v4296_v38, %v3118_v39  ;;  %v3220_v38 = vld [vmem:[%s6727_s1 + $0x1d8] sm:$0xf] }
  0xc4   : > { %v4460_v59 = vld [vmem:[%s6727_s1 + $0x62c] sm:$0xf0]  ;;  %v4352_v53 = vld [vmem:[%s6727_s1 + $0x2d4] sm:$0xf]  ;;  %v3889_v54 = vor.u32 %v4488_v46, %v3886_v47  ;;  %v4325_v39 = vld [vmem:[%s6727_s1 + $0x1f4] sm:$0xf0] }
  0xc5   : > { %2056 = vmatpush.bf16.msra.mxu3 %v3821_v42  ;;  %2029 = vmatpush.bf16.msra.mxu1 %v3277_v51  ;;  %v3757_v7 = vor.u32 %v4460_v59, %v3756_v58  ;;  %v3921_v42 = vor.u32 %v4496_v31, %v3918_v34  ;;  %v4288_v51 = vld [vmem:[%s6727_s1 + $0xd4] sm:$0xf]  ;;  %v4453_v45 = vld [vmem:[%s6727_s1 + $0x5f4] sm:$0xf0] }
  0xc6   : > { %v3342_v55 = vld [vmem:[%s6727_s1 + $0x2f0] sm:$0xf0] }
  0xc7   : > { %2043 = vmatpush.bf16.msra.mxu2 %v3533_v52  ;;  %2016 = vmatpush.bf16.msra.mxu0 %v2989_v63  ;;  %v3086_v52 = vld [vmem:[%s6727_s1 + $0xf0] sm:$0xf0]  ;;  %v3345_v61 = vor.u32 %v4352_v53, %v3342_v55  ;;  %v3477_v55 = vor.u32 %v4389_v43, %v3476_v40  ;;  %v3348_v40 = vld [vmem:[%s6727_s1 + $0x2d8] sm:$0xf] }
  0xc8   : > { %v3598_v57 = vld [vmem:[%s6727_s1 + $0x4f0] sm:$0xf0]  ;;  %v3089_v60 = vor.u32 %v4288_v51, %v3086_v52  ;;  %v3221_v52 = vor.u32 %v4325_v39, %v3220_v38  ;;  %v3092_v38 = vld [vmem:[%s6727_s1 + $0xd8] sm:$0xf] }
  0xc9   : > { %2057 = vmatpush.bf16.msra.mxu3 %v3789_v56  ;;  %2030 = vmatpush.bf16.msra.mxu1 %v3245_v3  ;;  %v4416_v56 = vld [vmem:[%s6727_s1 + $0x4d4] sm:$0xf]  ;;  %v4293_v39 = vld [vmem:[%s6727_s1 + $0xf4] sm:$0xf0] }
  0xca   : > { %2017 = vmatmul.bf16.vlgmr.msra.gmra.mxu0 %v4997_v33  ;;  %v4480_v58 = vld [vmem:[%s6727_s1 + $0x6d4] sm:$0xf]  ;;  %v3601_v62 = vor.u32 %v4416_v56, %v3598_v57  ;;  %v3733_v56 = vor.u32 %v4453_v45, %v3732_v44  ;;  %v3188_v57 = vld [vmem:[%s6727_s1 + $0x198] sm:$0xf] }
  0xcb   : > { %2044 = vmatpush.bf16.msra.mxu2 %v3501_v4  ;;  %2065 = vmatpush.bf16.msrb.mxu0 %v3217_v8  ;;  %v3854_v59 = vld [vmem:[%s6727_s1 + $0x6f0] sm:$0xf0]  ;;  %v1794_v23 = vpop.f32.mrf.mxu0  ;;  %v4357_v44 = vld [vmem:[%s6727_s1 + $0x2f4] sm:$0xf0] }
  0xcc   : > { %2031 = vmatmul.bf16.vlgmr.msra.gmra.mxu1 %v5008_v41  ;;  %v4280_v63 = vld [vmem:[%s6727_s1 + $0x94] sm:$0xf]  ;;  %v3857_v2 = vor.u32 %v4480_v58, %v3854_v59  ;;  %v4317_v58 = vld [vmem:[%s6727_s1 + $0x1b4] sm:$0xf0] }
  0xcd   : > { %2058 = vmatpush.bf16.msra.mxu3 %v3757_v7  ;;  %2079 = vmatpush.bf16.msrb.mxu1 %v3473_v9  ;;  %v3054_v0 = vld [vmem:[%s6727_s1 + $0xb0] sm:$0xf0]  ;;  %v1808_v30 = vpop.f32.mrf.mxu1  ;;  %v3444_v59 = vld [vmem:[%s6727_s1 + $0x398] sm:$0xf] }
  0xce   : > { %2045 = vmatmul.bf16.vlgmr.msra.gmra.mxu2 %v4993_v27  ;;  %v4344_v1 = vld [vmem:[%s6727_s1 + $0x294] sm:$0xf]  ;;  %v3057_v8 = vor.u32 %v4280_v63, %v3054_v0  ;;  %v4445_v63 = vld [vmem:[%s6727_s1 + $0x5b4] sm:$0xf0] }
  0xcf   : > { %2093 = vmatpush.bf16.msrb.mxu2 %v3729_v10  ;;  %2066 = vmatpush.bf16.msrb.mxu0 %v3185_v20  ;;  %v3310_v3 = vld [vmem:[%s6727_s1 + $0x2b0] sm:$0xf0]  ;;  %v3604_v45 = vld [vmem:[%s6727_s1 + $0x4d8] sm:$0xf] }
  0xd0   : > { %2059 = vmatmul.bf16.vlgmr.msra.gmra.mxu3 %v4995_v32  ;;  %v4408_v4 = vld [vmem:[%s6727_s1 + $0x494] sm:$0xf]  ;;  %v3313_v9 = vor.u32 %v4344_v1, %v3310_v3  ;;  %v3956_v1 = vld [vmem:[%s6727_s1 + $0x798] sm:$0xf]  ;;  %v3189_v3 = vor.u32 %v4317_v58, %v3188_v57 }
  0xd1   : > { %2107 = vmatpush.bf16.msrb.mxu3 %v3985_v14  ;;  %2080 = vmatpush.bf16.msrb.mxu1 %v3441_v21  ;;  %v3566_v5 = vld [vmem:[%s6727_s1 + $0x4b0] sm:$0xf0]  ;;  %v4349_v58 = vld [vmem:[%s6727_s1 + $0x2b4] sm:$0xf0] }
  0xd2   : > { %v4472_v6 = vld [vmem:[%s6727_s1 + $0x694] sm:$0xf]  ;;  %v3569_v10 = vor.u32 %v4408_v4, %v3566_v5 }
  0xd3   : > { %2094 = vmatpush.bf16.msrb.mxu2 %v3697_v22  ;;  %2067 = vmatpush.bf16.msrb.mxu0 %v3153_v35  ;;  %v3822_v7 = vld [vmem:[%s6727_s1 + $0x6b0] sm:$0xf0]  ;;  %v5911_v4 = vpop.f32.mrf.mxu0 }
  0xd4   : > { %v4272_v11 = vld [vmem:[%s6727_s1 + $0x54] sm:$0xf]  ;;  %v3825_v14 = vor.u32 %v4472_v6, %v3822_v7  ;;  %v3156_v7 = vld [vmem:[%s6727_s1 + $0x158] sm:$0xf] }
  0xd5   : > { %2108 = vmatpush.bf16.msrb.mxu3 %v3953_v26  ;;  %2081 = vmatpush.bf16.msrb.mxu1 %v3409_v36  ;;  %v3022_v12 = vld [vmem:[%s6727_s1 + $0x70] sm:$0xf0] }
  0xd6   : > { %v4336_v13 = vld [vmem:[%s6727_s1 + $0x254] sm:$0xf]  ;;  %v3025_v20 = vor.u32 %v4272_v11, %v3022_v12  ;;  %v4373_v12 = vld [vmem:[%s6727_s1 + $0x374] sm:$0xf0] }
  0xd7   : > { %2095 = vmatpush.bf16.msrb.mxu2 %v3665_v37  ;;  %2068 = vmatpush.bf16.msrb.mxu0 %v3121_v48  ;;  %v3278_v15 = vld [vmem:[%s6727_s1 + $0x270] sm:$0xf0]  ;;  %v1809_v37 = vadd.f32 %v1808_v30, %v1794_v23  ;;  %v3988_v48 = vld [vmem:[%s6727_s1 + $0x7d8] sm:$0xf] }
  0xd8   : > { %v4400_v16 = vld [vmem:[%s6727_s1 + $0x454] sm:$0xf]  ;;  %v3281_v24 = vor.u32 %v4336_v13, %v3278_v15  ;;  %v3668_v13 = vld [vmem:[%s6727_s1 + $0x558] sm:$0xf] }
  0xd9   : > { %2109 = vmatpush.bf16.msrb.mxu3 %v3921_v42  ;;  %2082 = vmatpush.bf16.msrb.mxu1 %v3377_v49  ;;  %v3534_v17 = vld [vmem:[%s6727_s1 + $0x470] sm:$0xf0]  ;;  %v4517_v49 = vld [vmem:[%s6727_s1 + $0x7f4] sm:$0xf0] }
  0xda   : > { %v4464_v18 = vld [vmem:[%s6727_s1 + $0x654] sm:$0xf]  ;;  %v3537_v25 = vor.u32 %v4400_v16, %v3534_v17  ;;  %v3924_v15 = vld [vmem:[%s6727_s1 + $0x758] sm:$0xf] }
  0xdb   : > { %2096 = vmatpush.bf16.msrb.mxu2 %v3633_v50  ;;  %2069 = vmatpush.bf16.msrb.mxu0 %v3089_v60  ;;  %v3790_v19 = vld [vmem:[%s6727_s1 + $0x670] sm:$0xf0]  ;;  %v1822_v50 = vpop.f32.mrf.mxu2  ;;  %v3989_v60 = vor.u32 %v4517_v49, %v3988_v48  ;;  %v4501_v16 = vld [vmem:[%s6727_s1 + $0x774] sm:$0xf0] }
  0xdc   : > { %v4264_v21 = vld [vmem:[%s6727_s1 + $0x14] sm:$0xf]  ;;  %v3793_v31 = vor.u32 %v4464_v18, %v3790_v19  ;;  %v1823_v53 = vadd.f32 %v1822_v50, %v1809_v37  ;;  %v3892_v30 = vld [vmem:[%s6727_s1 + $0x718] sm:$0xf]  ;;  %v3093_v50 = vor.u32 %v4293_v39, %v3092_v38 }
  0xdd   : > { %2110 = vmatpush.bf16.msrb.mxu3 %v3889_v54  ;;  %2083 = vmatpush.bf16.msrb.mxu1 %v3345_v61  ;;  %v2990_v22 = vld [vmem:[%s6727_s1 + $0x30] sm:$0xf0]  ;;  %v1836_v54 = vpop.f32.mrf.mxu3  ;;  %v4381_v61 = vld [vmem:[%s6727_s1 + $0x3b4] sm:$0xf0] }
  0xde   : > { %v4328_v26 = vld [vmem:[%s6727_s1 + $0x214] sm:$0xf]  ;;  %v2993_v42 = vor.u32 %v4264_v21, %v2990_v22  ;;  %v5903_v0 = vadd.f32 %v1836_v54, %v1823_v53  ;;  %v3445_v5 = vor.u32 %v4381_v61, %v3444_v59  ;;  %v4301_v21 = vld [vmem:[%s6727_s1 + $0x134] sm:$0xf0] }
  0xdf   : > { %2097 = vmatpush.bf16.msrb.mxu2 %v3601_v62  ;;  %2070 = vmatpush.bf16.msrb.mxu0 %v3057_v8  ;;  %v3246_v28 = vld [vmem:[%s6727_s1 + $0x230] sm:$0xf0]  ;;  %v3700_v62 = vld [vmem:[%s6727_s1 + $0x598] sm:$0xf] }
  0xe0   : > { %v4392_v29 = vld [vmem:[%s6727_s1 + $0x414] sm:$0xf]  ;;  %v3249_v46 = vor.u32 %v4328_v26, %v3246_v28  ;;  %v3701_v6 = vor.u32 %v4445_v63, %v3700_v62  ;;  %v4309_v8 = vld [vmem:[%s6727_s1 + $0x174] sm:$0xf0] }
  0xe1   : > { %2111 = vmatpush.bf16.msrb.mxu3 %v3857_v2  ;;  %2084 = vmatpush.bf16.msrb.mxu1 %v3313_v9  ;;  %v3502_v34 = vld [vmem:[%s6727_s1 + $0x430] sm:$0xf0]  ;;  %v4509_v2 = vld [vmem:[%s6727_s1 + $0x7b4] sm:$0xf0]  ;;  %v3157_v17 = vor.u32 %v4309_v8, %v3156_v7 }
  0xe2   : > { %v4456_v35 = vld [vmem:[%s6727_s1 + $0x614] sm:$0xf]  ;;  %v3505_v47 = vor.u32 %v4392_v29, %v3502_v34  ;;  %v3412_v9 = vld [vmem:[%s6727_s1 + $0x358] sm:$0xf]  ;;  %v3957_v11 = vor.u32 %v4509_v2, %v3956_v1  ;;  %v2241_v2 = vlaneseq }
  0xe3   : > { %2098 = vmatpush.bf16.msrb.mxu2 %v3569_v10  ;;  %v3758_v36 = vld [vmem:[%s6727_s1 + $0x630] sm:$0xf0]  ;;  %2071 = vmatpush.bf16.msrb.mxu0 %v3025_v20  ;;  %v5922_v10 = vpop.f32.mrf.mxu1  ;;  %v3413_v18 = vor.u32 %v4373_v12, %v3412_v9  ;;  %v3124_v20 = vld [vmem:[%s6727_s1 + $0x118] sm:$0xf]  ;;  %v5952_v23 = vpop.f32.mrf.mxu2 }
  0xe4   : > { %v3761_v51 = vor.u32 %v4456_v35, %v3758_v36  ;;  %v3380_v22 = vld [vmem:[%s6727_s1 + $0x318] sm:$0xf]  ;;  %v3125_v34 = vor.u32 %v4301_v21, %v3124_v20  ;;  %v6045_v21 = vshrl.u32 %v2241_v2, 7  ;;  %v3446_v2 = vld [vmem:[%s6727_s1 + $0x3b8] sm:$0xf0] }
  0xe5   : > { %2112 = vmatpush.bf16.msrb.mxu3 %v3825_v14  ;;  %2085 = vmatpush.bf16.msrb.mxu1 %v3281_v24  ;;  %v4437_v14 = vld [vmem:[%s6727_s1 + $0x574] sm:$0xf0]  ;;  %v3925_v24 = vor.u32 %v4501_v16, %v3924_v15  ;;  %v5963_v29 = vpop.f32.mrf.mxu3 }
  0xe6   : > { %v3669_v19 = vor.u32 %v4437_v14, %v3668_v13  ;;  %v3636_v26 = vld [vmem:[%s6727_s1 + $0x518] sm:$0xf]  ;;  %vm2243_vm0 = vcmp.lt.s32.totalorder %v6045_v21, 7 }
  0xe7   : > { %2099 = vmatpush.bf16.msrb.mxu2 %v3537_v25  ;;  %2072 = vmatpush.bf16.msrb.mxu0 %v2993_v42  ;;  %v4365_v25 = vld [vmem:[%s6727_s1 + $0x334] sm:$0xf0]  ;;  %v1850_v35 = vpop.f32.mrf.mxu0 }
  0xe8   : > { %v4429_v28 = vld [vmem:[%s6727_s1 + $0x534] sm:$0xf0]  ;;  %v3381_v36 = vor.u32 %v4365_v25, %v3380_v22 }
  0xe9   : > { %2113 = vmatpush.bf16.msrb.mxu3 %v3793_v31  ;;  %2086 = vmatpush.bf16.msrb.mxu1 %v3249_v46  ;;  %v4493_v31 = vld [vmem:[%s6727_s1 + $0x734] sm:$0xf0]  ;;  %v3637_v37 = vor.u32 %v4429_v28, %v3636_v26 }
  0xea   : > { %2073 = vmatmul.bf16.vlgmr.msrb.gmra.mxu0 %v4997_v33  ;;  %v3893_v43 = vor.u32 %v4493_v31, %v3892_v30  ;;  %v4421_v46 = vld [vmem:[%s6727_s1 + $0x4f4] sm:$0xf0] }
  0xeb   : > { %2100 = vmatpush.bf16.msrb.mxu2 %v3505_v47  ;;  %2121 = vmatpush.bf16.msra.mxu0 %v3221_v52  ;;  %v1864_v42 = vpop.f32.mrf.mxu1  ;;  %v3860_v48 = vld [vmem:[%s6727_s1 + $0x6d8] sm:$0xf]  ;;  %v3605_v52 = vor.u32 %v4421_v46, %v3604_v45  ;;  %v4385_v45 = vld [vmem:[%s6727_s1 + $0x3dc] sm:$0xf] }
  0xec   : > { %2087 = vmatmul.bf16.vlgmr.msrb.gmra.mxu1 %v5008_v41  ;;  %v1865_v47 = vadd.f32 %v1864_v42, %v1850_v35  ;;  %v4485_v49 = vld [vmem:[%s6727_s1 + $0x6f4] sm:$0xf0]  ;;  %v3478_v46 = vld [vmem:[%s6727_s1 + $0x3f8] sm:$0xf0] }
  0xed   : > { %2114 = vmatpush.bf16.msrb.mxu3 %v3761_v51  ;;  %2135 = vmatpush.bf16.msra.mxu1 %v3477_v55  ;;  %v3349_v51 = vor.u32 %v4357_v44, %v3348_v40  ;;  %v3060_v53 = vld [vmem:[%s6727_s1 + $0x98] sm:$0xf]  ;;  %v3861_v57 = vor.u32 %v4485_v49, %v3860_v48  ;;  %v4321_v40 = vld [vmem:[%s6727_s1 + $0x1dc] sm:$0xf] }
  0xee   : > { %2101 = vmatmul.bf16.vlgmr.msrb.gmra.mxu2 %v4993_v27  ;;  %v4285_v54 = vld [vmem:[%s6727_s1 + $0xb4] sm:$0xf0]  ;;  %v3222_v44 = vld [vmem:[%s6727_s1 + $0x1f8] sm:$0xf0] }
  0xef   : > { %2149 = vmatpush.bf16.msra.mxu2 %v3733_v56  ;;  %2122 = vmatpush.bf16.msra.mxu0 %v3189_v3  ;;  %v3316_v55 = vld [vmem:[%s6727_s1 + $0x298] sm:$0xf]  ;;  %v3061_v3 = vor.u32 %v4285_v54, %v3060_v53  ;;  %v4449_v48 = vld [vmem:[%s6727_s1 + $0x5dc] sm:$0xf] }
  0xf0   : > { %2115 = vmatmul.bf16.vlgmr.msrb.gmra.mxu3 %v4995_v32  ;;  %v3572_v59 = vld [vmem:[%s6727_s1 + $0x498] sm:$0xf]  ;;  %v3317_v7 = vor.u32 %v4349_v58, %v3316_v55  ;;  %v3734_v49 = vld [vmem:[%s6727_s1 + $0x5f8] sm:$0xf0] }
  0xf1   : > { %2163 = vmatpush.bf16.msra.mxu3 %v3989_v60  ;;  %2136 = vmatpush.bf16.msra.mxu1 %v3445_v5  ;;  %v1878_v56 = vpop.f32.mrf.mxu2  ;;  %v4413_v60 = vld [vmem:[%s6727_s1 + $0x4b4] sm:$0xf0]  ;;  %v4513_v54 = vld [vmem:[%s6727_s1 + $0x7dc] sm:$0xf] }
  0xf2   : > { %v1879_v61 = vadd.f32 %v1878_v56, %v1865_v47  ;;  %v3828_v63 = vld [vmem:[%s6727_s1 + $0x698] sm:$0xf]  ;;  %v3573_v8 = vor.u32 %v4413_v60, %v3572_v59  ;;  %v3990_v55 = vld [vmem:[%s6727_s1 + $0x7f8] sm:$0xf0]  ;;  %v3481_v59 = vor.u32 %v4385_v45, %v3478_v46  ;;  %v3737_v60 = vor.u32 %v4449_v48, %v3734_v49 }
  0xf3   : > { %2150 = vmatpush.bf16.msra.mxu2 %v3701_v6  ;;  %2123 = vmatpush.bf16.msra.mxu0 %v3157_v17  ;;  %v1892_v62 = vpop.f32.mrf.mxu3  ;;  %v4477_v1 = vld [vmem:[%s6727_s1 + $0x6b4] sm:$0xf0]  ;;  %v1852_v6 = vpop.f32.mrf.mxu0  ;;  %v4289_v46 = vld [vmem:[%s6727_s1 + $0xdc] sm:$0xf] }
  0xf4   : > { %v6019_v5 = vadd.f32 %v1892_v62, %v1879_v61  ;;  %v3028_v9 = vld [vmem:[%s6727_s1 + $0x58] sm:$0xf]  ;;  %v1866_v13 = vpop.f32.mrf.mxu1  ;;  %v3829_v14 = vor.u32 %v4477_v1, %v3828_v63  ;;  %v4313_v61 = vld [vmem:[%s6727_s1 + $0x19c] sm:$0xf]  ;;  %v3993_v1 = vor.u32 %v4513_v54, %v3990_v55 }
  0xf5   : > { %2164 = vmatpush.bf16.msra.mxu3 %v3957_v11  ;;  %2137 = vmatpush.bf16.msra.mxu1 %v3413_v18  ;;  %v4277_v11 = vld [vmem:[%s6727_s1 + $0x74] sm:$0xf0]  ;;  %v1867_v18 = vadd.f32 %v1866_v13, %v1852_v6  ;;  %v3190_v62 = vld [vmem:[%s6727_s1 + $0x1b8] sm:$0xf0] }
  0xf6   : > { %v3284_v12 = vld [vmem:[%s6727_s1 + $0x258] sm:$0xf]  ;;  %v3029_v22 = vor.u32 %v4277_v11, %v3028_v9  ;;  %v4377_v63 = vld [vmem:[%s6727_s1 + $0x39c] sm:$0xf]  ;;  %v3193_v11 = vor.u32 %v4313_v61, %v3190_v62 }
  0xf7   : > { %2151 = vmatpush.bf16.msra.mxu2 %v3669_v19  ;;  %2124 = vmatpush.bf16.msra.mxu0 %v3125_v34  ;;  %v4341_v15 = vld [vmem:[%s6727_s1 + $0x274] sm:$0xf0]  ;;  %v3958_v9 = vld [vmem:[%s6727_s1 + $0x7b8] sm:$0xf0] }
  0xf8   : > { %v3540_v16 = vld [vmem:[%s6727_s1 + $0x458] sm:$0xf]  ;;  %v3285_v28 = vor.u32 %v4341_v15, %v3284_v12  ;;  %v3449_v12 = vor.u32 %v4377_v63, %v3446_v2  ;;  %v3158_v15 = vld [vmem:[%s6727_s1 + $0x178] sm:$0xf0] }
  0xf9   : > { %2165 = vmatpush.bf16.msra.mxu3 %v3925_v24  ;;  %2138 = vmatpush.bf16.msra.mxu1 %v3381_v36  ;;  %v4405_v17 = vld [vmem:[%s6727_s1 + $0x474] sm:$0xf0]  ;;  %v1880_v36 = vpop.f32.mrf.mxu2  ;;  %v4353_v48 = vld [vmem:[%s6727_s1 + $0x2dc] sm:$0xf] }
  0xfa   : > { %v3796_v19 = vld [vmem:[%s6727_s1 + $0x658] sm:$0xf]  ;;  %v3541_v30 = vor.u32 %v4405_v17, %v3540_v16  ;;  %v1881_v42 = vadd.f32 %v1880_v36, %v1867_v18  ;;  %v4369_v16 = vld [vmem:[%s6727_s1 + $0x35c] sm:$0xf] }
  0xfb   : > { %2152 = vmatpush.bf16.msra.mxu2 %v3637_v37  ;;  %2125 = vmatpush.bf16.msra.mxu0 %v3093_v50  ;;  %v4469_v20 = vld [vmem:[%s6727_s1 + $0x674] sm:$0xf0]  ;;  %v2234_v50 = vrot.slane %v6019_v5, 1  ;;  %v3702_v5 = vld [vmem:[%s6727_s1 + $0x5b8] sm:$0xf0] }
  0xfc   : > { %v2996_v24 = vld [vmem:[%s6727_s1 + $0x18] sm:$0xf]  ;;  %v3797_v37 = vor.u32 %v4469_v20, %v3796_v19  ;;  %v3414_v18 = vld [vmem:[%s6727_s1 + $0x378] sm:$0xf0] }
  0xfd   : > { %2166 = vmatpush.bf16.msra.mxu3 %v3893_v43  ;;  %2139 = vmatpush.bf16.msra.mxu1 %v3349_v51  ;;  %v4269_v25 = vld [vmem:[%s6727_s1 + $0x34] sm:$0xf0]  ;;  %v1894_v43 = vpop.f32.mrf.mxu3  ;;  %v4433_v19 = vld [vmem:[%s6727_s1 + $0x55c] sm:$0xf] }
  0xfe   : > { %v3252_v26 = vld [vmem:[%s6727_s1 + $0x218] sm:$0xf]  ;;  %v2997_v47 = vor.u32 %v4269_v25, %v2996_v24  ;;  %v1895_v51 = vadd.f32 %v1894_v43, %v1881_v42  ;;  %v3670_v20 = vld [vmem:[%s6727_s1 + $0x578] sm:$0xf0] }
  0xff   : > { %2153 = vmatpush.bf16.msra.mxu2 %v3605_v52  ;;  %2126 = vmatpush.bf16.msra.mxu0 %v3061_v3  ;;  %v4333_v31 = vld [vmem:[%s6727_s1 + $0x234] sm:$0xf0]  ;;  %v4441_v3 = vld [vmem:[%s6727_s1 + $0x59c] sm:$0xf] }
 0x100   : > { %v3508_v34 = vld [vmem:[%s6727_s1 + $0x418] sm:$0xf]  ;;  %v3253_v52 = vor.u32 %v4333_v31, %v3252_v26  ;;  %v2238_v58 = vrot.slane %v1895_v51, 1  ;;  %v3705_v13 = vor.u32 %v4441_v3, %v3702_v5  ;;  %v3926_v24 = vld [vmem:[%s6727_s1 + $0x778] sm:$0xf0]  ;;  %v3417_v26 = vor.u32 %v4369_v16, %v3414_v18 }
 0x101   : > { %2167 = vmatpush.bf16.msra.mxu3 %v3861_v57  ;;  %2140 = vmatpush.bf16.msra.mxu1 %v3317_v7  ;;  %v4397_v35 = vld [vmem:[%s6727_s1 + $0x434] sm:$0xf0]  ;;  %v3225_v57 = vor.u32 %v4321_v40, %v3222_v44  ;;  %v3126_v31 = vld [vmem:[%s6727_s1 + $0x138] sm:$0xf0] }
 0x102   : > { %v3764_v38 = vld [vmem:[%s6727_s1 + $0x618] sm:$0xf]  ;;  %v3509_v53 = vor.u32 %v4397_v35, %v3508_v34  ;;  %v6117_v6 = vsel %vm2243_vm0, %v2234_v50, %v2238_v58  ;;  %v6121_v7 = vsel %vm2243_vm0, %v2238_v58, %v2234_v50  ;;  %v4361_v34 = vld [vmem:[%s6727_s1 + $0x31c] sm:$0xf] }
 0x103   : > { %2154 = vmatpush.bf16.msra.mxu2 %v3573_v8  ;;  %v4461_v39 = vld [vmem:[%s6727_s1 + $0x634] sm:$0xf0]  ;;  %2127 = vmatpush.bf16.msra.mxu0 %v3029_v22  ;;  %v4505_v8 = vld [vmem:[%s6727_s1 + $0x79c] sm:$0xf] }
 0x104   : > { %v3765_v56 = vor.u32 %v4461_v39, %v3764_v38  ;;  %v3961_v17 = vor.u32 %v4505_v8, %v3958_v9  ;;  %v4497_v22 = vld [vmem:[%s6727_s1 + $0x75c] sm:$0xf] }
 0x105   : > { %2168 = vmatpush.bf16.msra.mxu3 %v3829_v14  ;;  %2141 = vmatpush.bf16.msra.mxu1 %v3285_v28  ;;  %v4305_v14 = vld [vmem:[%s6727_s1 + $0x15c] sm:$0xf]  ;;  %v3673_v28 = vor.u32 %v4433_v19, %v3670_v20  ;;  %v3929_v35 = vor.u32 %v4497_v22, %v3926_v24 }
 0x106   : > { %v3161_v25 = vor.u32 %v4305_v14, %v3158_v15  ;;  %v3382_v36 = vld [vmem:[%s6727_s1 + $0x338] sm:$0xf0] }
 0x107   : > { %2155 = vmatpush.bf16.msra.mxu2 %v3541_v30  ;;  %2128 = vmatpush.bf16.msra.mxu0 %v2997_v47  ;;  %v4297_v30 = vld [vmem:[%s6727_s1 + $0x11c] sm:$0xf]  ;;  %v1906_v43 = vpop.f32.mrf.mxu0  ;;  %v3385_v44 = vor.u32 %v4361_v34, %v3382_v36 }
 0x108   : > { %v3638_v38 = vld [vmem:[%s6727_s1 + $0x538] sm:$0xf0]  ;;  %v3129_v42 = vor.u32 %v4297_v30, %v3126_v31 }
 0x109   : > { %2169 = vmatpush.bf16.msra.mxu3 %v3797_v37  ;;  %2142 = vmatpush.bf16.msra.mxu1 %v3253_v52  ;;  %v4425_v37 = vld [vmem:[%s6727_s1 + $0x51c] sm:$0xf]  ;;  %v1920_v49 = vpop.f32.mrf.mxu1 }
 0x10a   : > { %2129 = vmatmul.bf16.vlgmr.msra.gmra.mxu0 %v4997_v33  ;;  %v4489_v39 = vld [vmem:[%s6727_s1 + $0x71c] sm:$0xf]  ;;  %v3641_v45 = vor.u32 %v4425_v37, %v3638_v38  ;;  %v1921_v54 = vadd.f32 %v1920_v49, %v1906_v43 }
 0x10b   : > { %2156 = vmatpush.bf16.msra.mxu2 %v3509_v53  ;;  %2177 = vmatpush.bf16.msrb.mxu0 %v3225_v57  ;;  %v3894_v40 = vld [vmem:[%s6727_s1 + $0x738] sm:$0xf0] }
 0x10c   : > { %2143 = vmatmul.bf16.vlgmr.msra.gmra.mxu1 %v5008_v41  ;;  %v3094_v47 = vld [vmem:[%s6727_s1 + $0xf8] sm:$0xf0]  ;;  %v3897_v50 = vor.u32 %v4489_v39, %v3894_v40 }
 0x10d   : > { %2170 = vmatpush.bf16.msra.mxu3 %v3765_v56  ;;  %2191 = vmatpush.bf16.msrb.mxu1 %v3481_v59  ;;  %v3350_v51 = vld [vmem:[%s6727_s1 + $0x2f8] sm:$0xf0]  ;;  %v3097_v57 = vor.u32 %v4289_v46, %v3094_v47 }
 0x10e   : > { %2157 = vmatmul.bf16.vlgmr.msra.gmra.mxu2 %v4993_v27  ;;  %v4417_v52 = vld [vmem:[%s6727_s1 + $0x4dc] sm:$0xf]  ;;  %v3353_v58 = vor.u32 %v4353_v48, %v3350_v51  ;;  %v4052_v51 = vld [vmem:[%s6729_s3 + $0x70] sm:$0xf] }
 0x10f   : > { %2205 = vmatpush.bf16.msrb.mxu2 %v3737_v60  ;;  %2178 = vmatpush.bf16.msrb.mxu0 %v3193_v11  ;;  %v3606_v53 = vld [vmem:[%s6727_s1 + $0x4f8] sm:$0xf0]  ;;  %v1908_v15 = vpop.f32.mrf.mxu0 }
 0x110   : > { %2171 = vmatmul.bf16.vlgmr.msra.gmra.mxu3 %v4995_v32  ;;  %v4481_v55 = vld [vmem:[%s6727_s1 + $0x6dc] sm:$0xf]  ;;  %v3609_v59 = vor.u32 %v4417_v52, %v3606_v53  ;;  %v4533_v52 = vld [vmem:[%s6729_s3 + $0x74] sm:$0xf0] }
 0x111   : > { %2219 = vmatpush.bf16.msrb.mxu3 %v3993_v1  ;;  %2192 = vmatpush.bf16.msrb.mxu1 %v3449_v12  ;;  %v3862_v56 = vld [vmem:[%s6727_s1 + $0x6f8] sm:$0xf0]  ;;  %v1934_v63 = vpop.f32.mrf.mxu2  ;;  %v1922_v22 = vpop.f32.mrf.mxu1 }
 0x112   : > { %v4281_v60 = vld [vmem:[%s6727_s1 + $0x9c] sm:$0xf]  ;;  %v3865_v1 = vor.u32 %v4481_v55, %v3862_v56  ;;  %v1935_v8 = vadd.f32 %v1934_v63, %v1921_v54  ;;  %v1923_v30 = vadd.f32 %v1922_v22, %v1908_v15 }
 0x113   : > { %2206 = vmatpush.bf16.msrb.mxu2 %v3705_v13  ;;  %2179 = vmatpush.bf16.msrb.mxu0 %v3161_v25  ;;  %v3062_v61 = vld [vmem:[%s6727_s1 + $0xb8] sm:$0xf0]  ;;  %v1948_v9 = vpop.f32.mrf.mxu3 }
 0x114   : > { %v4345_v62 = vld [vmem:[%s6727_s1 + $0x29c] sm:$0xf]  ;;  %v3065_v13 = vor.u32 %v4281_v60, %v3062_v61  ;;  %v1949_v14 = vadd.f32 %v1948_v9, %v1935_v8  ;;  %v4053_v60 = vor.u32 %v4533_v52, %v4052_v51  ;;  %v4044_v61 = vld [vmem:[%s6729_s3 + $0x60] sm:$0xf]  ;;  %v4527_v9 = vld [vmem:[%s6729_s3 + $0x44] sm:$0xf0] }
 0x115   : > { %2220 = vmatpush.bf16.msrb.mxu3 %v3961_v17  ;;  %2193 = vmatpush.bf16.msrb.mxu1 %v3417_v26  ;;  %v3318_v2 = vld [vmem:[%s6727_s1 + $0x2b8] sm:$0xf0]  ;;  %v4108_v52 = vld [vmem:[%s6729_s3 + $0xe0] sm:$0xf] }
 0x116   : > { %v4409_v3 = vld [vmem:[%s6727_s1 + $0x49c] sm:$0xf]  ;;  %v3321_v16 = vor.u32 %v4345_v62, %v3318_v2  ;;  %v2235_v54 = vrot.slane %v1949_v14, 1  ;;  %v4531_v62 = vld [vmem:[%s6729_s3 + $0x64] sm:$0xf0] }
 0x117   : > { %2207 = vmatpush.bf16.msrb.mxu2 %v3673_v28  ;;  %2180 = vmatpush.bf16.msrb.mxu0 %v3129_v42  ;;  %v3574_v5 = vld [vmem:[%s6727_s1 + $0x4b8] sm:$0xf0]  ;;  %v4045_v2 = vor.u32 %v4531_v62, %v4044_v61  ;;  %v1811_v62 = vadd.f32 %v5922_v10, %v5911_v4  ;;  %v4030_v4 = vld [vmem:[%s6729_s3 + $0x48] sm:$0xf0] }
 0x118   : > { %v4473_v11 = vld [vmem:[%s6727_s1 + $0x69c] sm:$0xf]  ;;  %v3577_v17 = vor.u32 %v4409_v3, %v3574_v5  ;;  %v4036_v3 = vld [vmem:[%s6729_s3 + $0x50] sm:$0xf]  ;;  %v4529_v5 = vld [vmem:[%s6729_s3 + $0x54] sm:$0xf0] }
 0x119   : > { %2221 = vmatpush.bf16.msrb.mxu3 %v3929_v35  ;;  %2194 = vmatpush.bf16.msrb.mxu1 %v3385_v44  ;;  %v3830_v12 = vld [vmem:[%s6727_s1 + $0x6b8] sm:$0xf0]  ;;  %v1936_v43 = vpop.f32.mrf.mxu2  ;;  %v4037_v8 = vor.u32 %v4529_v5, %v4036_v3  ;;  %v4092_v5 = vld [vmem:[%s6729_s3 + $0xc0] sm:$0xf]  ;;  %v1825_v10 = vadd.f32 %v5952_v23, %v1811_v62  ;;  %v4524_v23 = vld [vmem:[%s6729_s3 + $0x34] sm:$0xf] }
 0x11a   : > { %v4273_v18 = vld [vmem:[%s6727_s1 + $0x5c] sm:$0xf]  ;;  %v3833_v24 = vor.u32 %v4473_v11, %v3830_v12  ;;  %v1937_v48 = vadd.f32 %v1936_v43, %v1923_v30  ;;  %v4521_v30 = vld [vmem:[%s6729_s3 + $0x14] sm:$0xf0]  ;;  %v4116_v43 = vld [vmem:[%s6729_s3 + $0xf0] sm:$0xf] }
 0x11b   : > { %2208 = vmatpush.bf16.msrb.mxu2 %v3641_v45  ;;  %2181 = vmatpush.bf16.msrb.mxu0 %v3097_v57  ;;  %v3030_v19 = vld [vmem:[%s6727_s1 + $0x78] sm:$0xf0]  ;;  %v1950_v49 = vpop.f32.mrf.mxu3 }
 0x11c   : > { %v4337_v20 = vld [vmem:[%s6727_s1 + $0x25c] sm:$0xf]  ;;  %v3033_v35 = vor.u32 %v4273_v18, %v3030_v19  ;;  %v1951_v55 = vadd.f32 %v1950_v49, %v1937_v48  ;;  %v4012_v19 = vld [vmem:[%s6729_s3 + $0x20] sm:$0xf] }
 0x11d   : > { %2222 = vmatpush.bf16.msrb.mxu3 %v3897_v50  ;;  %2195 = vmatpush.bf16.msrb.mxu1 %v3353_v58  ;;  %v3286_v25 = vld [vmem:[%s6727_s1 + $0x278] sm:$0xf0] }
 0x11e   : > { %v4401_v26 = vld [vmem:[%s6727_s1 + $0x45c] sm:$0xf]  ;;  %v3289_v37 = vor.u32 %v4337_v20, %v3286_v25  ;;  %v4523_v20 = vld [vmem:[%s6729_s3 + $0x24] sm:$0xf0] }
 0x11f   : > { %2209 = vmatpush.bf16.msrb.mxu2 %v3609_v59  ;;  %v3542_v28 = vld [vmem:[%s6727_s1 + $0x478] sm:$0xf0]  ;;  %2182 = vmatpush.bf16.msrb.mxu0 %v3065_v13  ;;  %v2239_v59 = vrot.slane %v1951_v55, 1  ;;  %v4013_v25 = vor.u32 %v4523_v20, %v4012_v19 }
 0x120   : > { %v4465_v31 = vld [vmem:[%s6727_s1 + $0x65c] sm:$0xf]  ;;  %v3545_v38 = vor.u32 %v4401_v26, %v3542_v28  ;;  %v4004_v28 = vld [vmem:[%s6729_s3 + $0x10] sm:$0xf] }
 0x121   : > { %2223 = vmatpush.bf16.msrb.mxu3 %v3865_v1  ;;  %v3798_v34 = vld [vmem:[%s6727_s1 + $0x678] sm:$0xf0]  ;;  %2196 = vmatpush.bf16.msrb.mxu1 %v3321_v16  ;;  %v6291_v63 = vsel %vm2243_vm0, %v2235_v54, %v2239_v59  ;;  %v6295_v1 = vsel %vm2243_vm0, %v2239_v59, %v2235_v54  ;;  %v4530_v54 = vld [vmem:[%s6729_s3 + $0x64] sm:$0xf] }
 0x122   : > { %v4265_v36 = vld [vmem:[%s6727_s1 + $0x1c] sm:$0xf]  ;;  %v3801_v44 = vor.u32 %v4465_v31, %v3798_v34  ;;  %v4005_v34 = vor.u32 %v4521_v30, %v4004_v28 }
 0x123   : > { %2210 = vmatpush.bf16.msrb.mxu2 %v3577_v17  ;;  %v2998_v39 = vld [vmem:[%s6727_s1 + $0x38] sm:$0xf0]  ;;  %2183 = vmatpush.bf16.msrb.mxu0 %v3033_v35 }
 0x124   : > { %v4329_v40 = vld [vmem:[%s6727_s1 + $0x21c] sm:$0xf]  ;;  %v3001_v53 = vor.u32 %v4265_v36, %v2998_v39  ;;  %v3996_v39 = vld [vmem:[%s6729_s3] sm:$0xf] }
 0x125   : > { %v3254_v42 = vld [vmem:[%s6727_s1 + $0x238] sm:$0xf0]  ;;  %2224 = vmatpush.bf16.msrb.mxu3 %v3833_v24  ;;  %2197 = vmatpush.bf16.msrb.mxu1 %v3289_v37 }
 0x126   : > { %v4393_v45 = vld [vmem:[%s6727_s1 + $0x41c] sm:$0xf]  ;;  %v3257_v56 = vor.u32 %v4329_v40, %v3254_v42  ;;  %v4519_v40 = vld [vmem:[%s6729_s3 + $0x4] sm:$0xf0] }
 0x127   : > { %v3510_v46 = vld [vmem:[%s6727_s1 + $0x438] sm:$0xf0]  ;;  %2211 = vmatpush.bf16.msrb.mxu2 %v3545_v38  ;;  %2184 = vmatpush.bf16.msrb.mxu0 %v3001_v53  ;;  %v1962_v11 = vpop.f32.mrf.mxu0  ;;  %v3997_v42 = vor.u32 %v4519_v40, %v3996_v39  ;;  %v4547_v53 = vld [vmem:[%s6729_s3 + $0xe4] sm:$0xf0] }
 0x128   : > { %v4457_v47 = vld [vmem:[%s6727_s1 + $0x61c] sm:$0xf]  ;;  %v3513_v57 = vor.u32 %v4393_v45, %v3510_v46  ;;  %v4532_v45 = vld [vmem:[%s6729_s3 + $0x74] sm:$0xf]  ;;  %v4109_v55 = vor.u32 %v4547_v53, %v4108_v52 }
 0x129   : > { %v3766_v50 = vld [vmem:[%s6727_s1 + $0x638] sm:$0xf0]  ;;  %2225 = vmatpush.bf16.msrb.mxu3 %v3801_v44  ;;  %2198 = vmatpush.bf16.msrb.mxu1 %v3257_v56  ;;  %v1976_v13 = vpop.f32.mrf.mxu1  ;;  %v4549_v44 = vld [vmem:[%s6729_s3 + $0xf4] sm:$0xf0]  ;;  %v4046_v56 = vld [vmem:[%s6729_s3 + $0x68] sm:$0xf0] }
 0x12a   : > { %v3769_v58 = vor.u32 %v4457_v47, %v3766_v50  ;;  %2185 = vmatmul.bf16.vlgmr.msrb.gmra.mxu0 %v4997_v33  ;;  %v4028_v33 = vld [vmem:[%s6729_s3 + $0x40] sm:$0xf]  ;;  %v1977_v14 = vadd.f32 %v1976_v13, %v1962_v11  ;;  %v4117_v47 = vor.u32 %v4549_v44, %v4116_v43  ;;  %v4054_v48 = vld [vmem:[%s6729_s3 + $0x78] sm:$0xf0]  ;;  %v4049_v59 = vor.u32 %v4530_v54, %v4046_v56  ;;  %v4537_v43 = vld [vmem:[%s6729_s3 + $0x94] sm:$0xf0] }
 0x12b   : > { %2212 = vmatpush.bf16.msrb.mxu2 %v3513_v57  ;;  %2682 = vmatpush.bf16.msra.mxu0 %v4053_v60  ;;  %v4029_v12 = vor.u32 %v4527_v9, %v4028_v33  ;;  %v4057_v49 = vor.u32 %v4532_v45, %v4054_v48  ;;  %v4100_v57 = vld [vmem:[%s6729_s3 + $0xd0] sm:$0xf]  ;;  %v4528_v60 = vld [vmem:[%s6729_s3 + $0x54] sm:$0xf]  ;;  %v4038_v61 = vld [vmem:[%s6729_s3 + $0x58] sm:$0xf0] }
 0x12c   : > { %2199 = vmatmul.bf16.vlgmr.msrb.gmra.mxu1 %v5008_v41  ;;  %v4041_v3 = vor.u32 %v4528_v60, %v4038_v61  ;;  %v4526_v33 = vld [vmem:[%s6729_s3 + $0x44] sm:$0xf]  ;;  %v4520_v44 = vld [vmem:[%s6729_s3 + $0x14] sm:$0xf]  ;;  %v4060_v54 = vld [vmem:[%s6729_s3 + $0x80] sm:$0xf] }
 0x12d   : > { %2226 = vmatpush.bf16.msrb.mxu3 %v3769_v58  ;;  %2696 = vmatpush.bf16.msra.mxu1 %v4117_v47  ;;  %v4545_v58 = vld [vmem:[%s6729_s3 + $0xd4] sm:$0xf0]  ;;  %v4033_v11 = vor.u32 %v4526_v33, %v4030_v4  ;;  %v4518_v56 = vld [vmem:[%s6729_s3 + $0x4] sm:$0xf]  ;;  %v4180_v60 = vld [vmem:[%s6729_s3 + $0x170] sm:$0xf] }
 0x12e   : > { %2213 = vmatmul.bf16.vlgmr.msrb.gmra.mxu2 %v4993_v27  ;;  %v4020_v27 = vld [vmem:[%s6729_s3 + $0x30] sm:$0xf]  ;;  %v4565_v61 = vld [vmem:[%s6729_s3 + $0x174] sm:$0xf0] }
 0x12f   : > { %2683 = vmatpush.bf16.msra.mxu0 %v4045_v2  ;;  %v1964_v22 = vpop.f32.mrf.mxu0  ;;  %v4101_v2 = vor.u32 %v4545_v58, %v4100_v57 }
 0x130   : > { %2227 = vmatmul.bf16.vlgmr.msrb.gmra.mxu3 %v4995_v32  ;;  %v4525_v32 = vld [vmem:[%s6729_s3 + $0x34] sm:$0xf0] }
 0x131   : > { %v1990_v41 = vpop.f32.mrf.mxu2  ;;  %v4021_v15 = vor.u32 %v4525_v32, %v4020_v27  ;;  %v1978_v24 = vpop.f32.mrf.mxu1  ;;  %2697 = vmatpush.bf16.msra.mxu1 %v4109_v55  ;;  %v4084_v32 = vld [vmem:[%s6729_s3 + $0xb0] sm:$0xf]  ;;  %v4535_v55 = vld [vmem:[%s6729_s3 + $0x84] sm:$0xf0] }
 0x132   : > { %v1991_v16 = vadd.f32 %v1990_v41, %v1977_v14  ;;  %v1979_v26 = vadd.f32 %v1978_v24, %v1964_v22  ;;  %v1839_v14 = vadd.f32 %v5963_v29, %v1825_v10  ;;  %v4541_v41 = vld [vmem:[%s6729_s3 + $0xb4] sm:$0xf0]  ;;  %v4022_v29 = vld [vmem:[%s6729_s3 + $0x38] sm:$0xf0]  ;;  %v6413_v24 = vld [vmem:[%s6728_s2] sm:$0xf]  ;;  %v4061_v58 = vor.u32 %v4535_v55, %v4060_v54 }
 0x133   : > { %2684 = vmatpush.bf16.msra.mxu0 %v4037_v8  ;;  %v2004_v17 = vpop.f32.mrf.mxu3  ;;  %v4543_v8 = vld [vmem:[%s6729_s3 + $0xc4] sm:$0xf0] }
 0x134   : > { %v2005_v18 = vadd.f32 %v2004_v17, %v1991_v16  ;;  %v4093_v9 = vor.u32 %v4543_v8, %v4092_v5  ;;  %v4025_v17 = vor.u32 %v4524_v23, %v4022_v29  ;;  %v2237_v19 = vrot.slane %v1839_v14, 1  ;;  %v4548_v5 = vld [vmem:[%s6729_s3 + $0xf4] sm:$0xf]  ;;  %v4118_v8 = vld [vmem:[%s6729_s3 + $0xf8] sm:$0xf0] }
 0x135   : > { %2698 = vmatpush.bf16.msra.mxu1 %v4101_v2  ;;  %v4121_v4 = vor.u32 %v4548_v5, %v4118_v8  ;;  %v4164_v23 = vld [vmem:[%s6729_s3 + $0x150] sm:$0xf]  ;;  %v4070_v5 = vld [vmem:[%s6729_s3 + $0x98] sm:$0xf0] }
 0x136   : > { %v2236_v37 = vrot.slane %v2005_v18, 1  ;;  %v2233_v18 = vrot.slane %v5903_v0, 1  ;;  %v4522_v0 = vld [vmem:[%s6729_s3 + $0x24] sm:$0xf] }
 0x137   : > { %2685 = vmatpush.bf16.msra.mxu0 %v4029_v12 }
 0x138   : > { %v2248_v62 = vsel %vm2243_vm0, %v2237_v19, %v2233_v18 }
 0x139   : > { %v1992_v31 = vpop.f32.mrf.mxu2  ;;  %2699 = vmatpush.bf16.msra.mxu1 %v4093_v9 }
 0x13a   : > { %v1993_v35 = vadd.f32 %v1992_v31, %v1979_v26  ;;  %v4539_v26 = vld [vmem:[%s6729_s3 + $0xa4] sm:$0xf0] }
 0x13b   : > { %2686 = vmatpush.bf16.msra.mxu0 %v4021_v15  ;;  %v2006_v36 = vpop.f32.mrf.mxu3  ;;  %v4085_v15 = vor.u32 %v4541_v41, %v4084_v32 }
 0x13c   : > { %v2007_v38 = vadd.f32 %v2006_v36, %v1993_v35 }
 0x13d   : > { %2700 = vmatpush.bf16.msra.mxu1 %v4085_v15  ;;  %v4561_v15 = vld [vmem:[%s6729_s3 + $0x154] sm:$0xf0] }
 0x13e   : > { %v2240_v46 = vrot.slane %v2007_v38, 1  ;;  %v2262_v38 = vperm.slane %v6413_v24, 0  ;;  %v4165_v29 = vor.u32 %v4561_v15, %v4164_v23  ;;  %v4581_v23 = vld [vmem:[%s6729_s3 + $0x1f4] sm:$0xf0]  ;;  %v4564_v15 = vld [vmem:[%s6729_s3 + $0x174] sm:$0xf] }
 0x13f   : > { %2687 = vmatpush.bf16.msra.mxu0 %v4013_v25  ;;  %v4076_v25 = vld [vmem:[%s6729_s3 + $0xa0] sm:$0xf] }
 0x140   : > { %v6351_v50 = vsel %vm2243_vm0, %v2236_v37, %v2240_v46  ;;  %v6355_v51 = vsel %vm2243_vm0, %v2240_v46, %v2236_v37  ;;  %v4077_v31 = vor.u32 %v4539_v26, %v4076_v25  ;;  %v2244_v37 = vsel %vm2243_vm0, %v2233_v18, %v2237_v19  ;;  %v4006_v46 = vld [vmem:[%s6729_s3 + $0x18] sm:$0xf0]  ;;  %v4156_v19 = vld [vmem:[%s6729_s3 + $0x140] sm:$0xf]  ;;  %v4094_v25 = vld [vmem:[%s6729_s3 + $0xc8] sm:$0xf0] }
 0x141   : > { %v4009_v48 = vor.u32 %v4520_v44, %v4006_v46 }
 0x142   : > { %2701 = vmatpush.bf16.msra.mxu1 %v4077_v31 }
 0x143   : > { %2688 = vmatpush.bf16.msra.mxu0 %v4005_v34  ;;  %v4014_v34 = vld [vmem:[%s6729_s3 + $0x28] sm:$0xf0] }
 0x144   : > { %v4017_v36 = vor.u32 %v4522_v0, %v4014_v34 }
 0x147   : > { %2689 = vmatpush.bf16.msra.mxu0 %v3997_v42  ;;  %v2018_v12 = vpop.f32.mrf.mxu0  ;;  %v4068_v42 = vld [vmem:[%s6729_s3 + $0x90] sm:$0xf] }
 0x148   : > { %v4069_v45 = vor.u32 %v4537_v43, %v4068_v42  ;;  %v4086_v42 = vld [vmem:[%s6729_s3 + $0xb8] sm:$0xf0] }
 0x149   : > { %v2032_v13 = vpop.f32.mrf.mxu1 }
 0x14a   : > { %v2033_v27 = vadd.f32 %v2032_v13, %v2018_v12  ;;  %2702 = vmatpush.bf16.msra.mxu1 %v4069_v45  ;;  %v4563_v12 = vld [vmem:[%s6729_s3 + $0x164] sm:$0xf0]  ;;  %v4546_v13 = vld [vmem:[%s6729_s3 + $0xe4] sm:$0xf] }
 0x14b   : > { %2738 = vmatpush.bf16.msrb.mxu0 %v4057_v49 }
 0x14e   : > { %2703 = vmatpush.bf16.msra.mxu1 %v4061_v58 }
 0x14f   : > { %2739 = vmatpush.bf16.msrb.mxu0 %v4049_v59  ;;  %v2020_v30 = vpop.f32.mrf.mxu0  ;;  %v3998_v59 = vld [vmem:[%s6729_s3 + $0x8] sm:$0xf0] }
 0x150   : > { %v4001_v2 = vor.u32 %v4518_v56, %v3998_v59 }
 0x151   : > { %v2046_v16 = vpop.f32.mrf.mxu2  ;;  %v2034_v35 = vpop.f32.mrf.mxu1 }
 0x152   : > { %v2047_v20 = vadd.f32 %v2046_v16, %v2033_v27  ;;  %v2035_v39 = vadd.f32 %v2034_v35, %v2020_v30  ;;  %2752 = vmatpush.bf16.msrb.mxu1 %v4121_v4  ;;  %v4110_v27 = vld [vmem:[%s6729_s3 + $0xe8] sm:$0xf0]  ;;  %v4544_v16 = vld [vmem:[%s6729_s3 + $0xd4] sm:$0xf] }
 0x153   : > { %2740 = vmatpush.bf16.msrb.mxu0 %v4041_v3  ;;  %v2060_v22 = vpop.f32.mrf.mxu3  ;;  %v4181_v3 = vor.u32 %v4565_v61, %v4180_v60  ;;  %v4113_v41 = vor.u32 %v4546_v13, %v4110_v27  ;;  %v4132_v61 = vld [vmem:[%s6729_s3 + $0x110] sm:$0xf]  ;;  %v4534_v13 = vld [vmem:[%s6729_s3 + $0x84] sm:$0xf] }
 0x154   : > { %v2061_v28 = vadd.f32 %v2060_v22, %v2047_v20  ;;  %v4559_v20 = vld [vmem:[%s6729_s3 + $0x144] sm:$0xf0]  ;;  %v4542_v22 = vld [vmem:[%s6729_s3 + $0xc4] sm:$0xf]  ;;  %v4244_v27 = vld [vmem:[%s6729_s3 + $0x1f0] sm:$0xf] }
 0x155   : > { %2710 = vmatpush.bf16.msra.mxu2 %v4181_v3  ;;  %v4157_v26 = vor.u32 %v4559_v20, %v4156_v19  ;;  %v4097_v0 = vor.u32 %v4542_v22, %v4094_v25  ;;  %v4236_v20 = vld [vmem:[%s6729_s3 + $0x1e0] sm:$0xf]  ;;  %v4579_v22 = vld [vmem:[%s6729_s3 + $0x1e4] sm:$0xf0]  ;;  %v4562_v25 = vld [vmem:[%s6729_s3 + $0x164] sm:$0xf] }
 0x156   : > { %v2252_v40 = vadd.f32 %v2244_v37, %v2061_v28  ;;  %2753 = vmatpush.bf16.msrb.mxu1 %v4113_v41  ;;  %v4148_v37 = vld [vmem:[%s6729_s3 + $0x130] sm:$0xf] }
 0x157   : > { %2741 = vmatpush.bf16.msrb.mxu0 %v4033_v11  ;;  %v4172_v11 = vld [vmem:[%s6729_s3 + $0x160] sm:$0xf] }
 0x158   : > { %v2270_v53 = vadd.f32 %v2262_v38, %v2252_v40  ;;  %v4173_v14 = vor.u32 %v4563_v12, %v4172_v11  ;;  %v4551_v11 = vld [vmem:[%s6729_s3 + $0x104] sm:$0xf0] }
 0x159   : > { %v2048_v47 = vpop.f32.mrf.mxu2 }
 0x15a   : > { %v2049_v49 = vadd.f32 %v2048_v47, %v2035_v39  ;;  %v2278_v10 = vmax.f32 %v2270_v53, 0.0  ;;  %2711 = vmatpush.bf16.msra.mxu2 %v4173_v14  ;;  %v4540_v39 = vld [vmem:[%s6729_s3 + $0xb4] sm:$0xf]  ;;  %v4140_v47 = vld [vmem:[%s6729_s3 + $0x120] sm:$0xf] }
 0x15b   : > { %2742 = vmatpush.bf16.msrb.mxu0 %v4025_v17  ;;  %v2062_v52 = vpop.f32.mrf.mxu3  ;;  %v4102_v17 = vld [vmem:[%s6729_s3 + $0xd8] sm:$0xf0]  ;;  %v4089_v43 = vor.u32 %v4540_v39, %v4086_v42  ;;  %v4078_v53 = vld [vmem:[%s6729_s3 + $0xa8] sm:$0xf0]  ;;  %v4220_v39 = vld [vmem:[%s6729_s3 + $0x1c0] sm:$0xf] }
 0x15c   : > { %v2063_v57 = vadd.f32 %v2062_v52, %v2049_v49  ;;  %4591 = vtanh.f32 %v2278_v10  ;;  %v4105_v18 = vor.u32 %v4544_v16, %v4102_v17  ;;  %v4538_v49 = vld [vmem:[%s6729_s3 + $0xa4] sm:$0xf]  ;;  %v4062_v14 = vld [vmem:[%s6729_s3 + $0x88] sm:$0xf0]  ;;  %v4245_v16 = vor.u32 %v4581_v23, %v4244_v27 }
 0x15d   : > { %v4081_v56 = vor.u32 %v4538_v49, %v4078_v53  ;;  %v4065_v41 = vor.u32 %v4534_v13, %v4062_v14  ;;  %v4558_v42 = vld [vmem:[%s6729_s3 + $0x144] sm:$0xf]  ;;  %v4212_v53 = vld [vmem:[%s6729_s3 + $0x1b0] sm:$0xf]  ;;  %v4552_v13 = vld [vmem:[%s6729_s3 + $0x114] sm:$0xf] }
 0x15e   : > { %v2256_v33 = vadd.f32 %v2248_v62, %v2063_v57  ;;  %2712 = vmatpush.bf16.msra.mxu2 %v4165_v29  ;;  %2754 = vmatpush.bf16.msrb.mxu1 %v4105_v18  ;;  %v2263_v57 = vperm.slane %v6413_v24, 1  ;;  %v4553_v62 = vld [vmem:[%s6729_s3 + $0x114] sm:$0xf0]  ;;  %v4182_v29 = vld [vmem:[%s6729_s3 + $0x178] sm:$0xf0]  ;;  %v2264_v23 = vperm.slane %v6413_v24, 2 }
 0x15f   : > { %2743 = vmatpush.bf16.msrb.mxu0 %v4017_v36  ;;  %v4133_v3 = vor.u32 %v4553_v62, %v4132_v61  ;;  %v4185_v17 = vor.u32 %v4564_v15, %v4182_v29  ;;  %2724 = vmatpush.bf16.msra.mxu3 %v4245_v16  ;;  %v4204_v61 = vld [vmem:[%s6729_s3 + $0x1a0] sm:$0xf]  ;;  %v4571_v62 = vld [vmem:[%s6729_s3 + $0x1a4] sm:$0xf0] }
 0x160   : > { %v2274_v9 = vadd.f32 %v2262_v38, %v2256_v33  ;;  %v4557_v38 = vld [vmem:[%s6729_s3 + $0x134] sm:$0xf0]  ;;  %v4188_v16 = vld [vmem:[%s6729_s3 + $0x180] sm:$0xf] }
 0x161   : > { %v4149_v40 = vor.u32 %v4557_v38, %v4148_v37  ;;  %v4166_v37 = vld [vmem:[%s6729_s3 + $0x158] sm:$0xf0] }
 0x162   : > { %v2282_v32 = vmax.f32 %v2274_v9, 0.0  ;;  %v4592_v28 = vpop.eup %4591  ;;  %2713 = vmatpush.bf16.msra.mxu2 %v4157_v26  ;;  %2755 = vmatpush.bf16.msrb.mxu1 %v4097_v0  ;;  %v4124_v9 = vld [vmem:[%s6729_s3 + $0x100] sm:$0xf]  ;;  %v4237_v0 = vor.u32 %v4579_v22, %v4236_v20  ;;  %v4126_v22 = vld [vmem:[%s6729_s3 + $0x108] sm:$0xf0] }
 0x163   : > { %2744 = vmatpush.bf16.msrb.mxu0 %v4009_v48  ;;  %v4555_v48 = vld [vmem:[%s6729_s3 + $0x124] sm:$0xf0]  ;;  %v4125_v12 = vor.u32 %v4551_v11, %v4124_v9  ;;  %v4196_v11 = vld [vmem:[%s6729_s3 + $0x190] sm:$0xf] }
 0x164   : > { %4593 = vtanh.f32 %v2282_v32  ;;  %v4141_v52 = vor.u32 %v4555_v48, %v4140_v47  ;;  %2725 = vmatpush.bf16.msra.mxu3 %v4237_v0 }
 0x166   : > { %2714 = vmatpush.bf16.msra.mxu2 %v4149_v40  ;;  %2756 = vmatpush.bf16.msrb.mxu1 %v4089_v43  ;;  %v4575_v40 = vld [vmem:[%s6729_s3 + $0x1c4] sm:$0xf0] }
 0x167   : > { %2745 = vmatpush.bf16.msrb.mxu0 %v4001_v2  ;;  %v2074_v31 = vpop.f32.mrf.mxu0  ;;  %v4536_v2 = vld [vmem:[%s6729_s3 + $0x94] sm:$0xf]  ;;  %v4221_v43 = vor.u32 %v4575_v40, %v4220_v39  ;;  %v4230_v40 = vld [vmem:[%s6729_s3 + $0x1d8] sm:$0xf0] }
 0x169   : > { %v2088_v34 = vpop.f32.mrf.mxu1 }
 0x16a   : > { %v4594_v30 = vpop.eup %4593  ;;  %v2089_v36 = vadd.f32 %v2088_v34, %v2074_v31  ;;  %2715 = vmatpush.bf16.msra.mxu2 %v4141_v52  ;;  %2757 = vmatpush.bf16.msrb.mxu1 %v4081_v56  ;;  %v4228_v31 = vld [vmem:[%s6729_s3 + $0x1d0] sm:$0xf]  ;;  %v4577_v34 = vld [vmem:[%s6729_s3 + $0x1d4] sm:$0xf0] }
 0x16b   : > { %v2294_v35 = vpack.c.bf16 %v4594_v30, %v4592_v28 }
 0x16d   : > { %2690 = vmatmul.bf16.vlgmr.msra.gmra.mxu0 %v2294_v35 }
 0x16e   : > { %2716 = vmatpush.bf16.msra.mxu2 %v4133_v3 }
 0x16f   : > { %v2076_v55 = vpop.f32.mrf.mxu0 }
 0x171   : > { %v2102_v44 = vpop.f32.mrf.mxu2  ;;  %v2090_v58 = vpop.f32.mrf.mxu1 }
 0x172   : > { %v2103_v45 = vadd.f32 %v2102_v44, %v2089_v36  ;;  %v2091_v60 = vadd.f32 %v2090_v58, %v2076_v55  ;;  %2717 = vmatpush.bf16.msra.mxu2 %v4125_v12  ;;  %v4560_v36 = vld [vmem:[%s6729_s3 + $0x154] sm:$0xf]  ;;  %v4158_v44 = vld [vmem:[%s6729_s3 + $0x148] sm:$0xf0]  ;;  %v4150_v58 = vld [vmem:[%s6729_s3 + $0x138] sm:$0xf0] }
 0x173   : > { %v2116_v46 = vpop.f32.mrf.mxu3  ;;  %v4169_v38 = vor.u32 %v4560_v36, %v4166_v37  ;;  %v4556_v55 = vld [vmem:[%s6729_s3 + $0x134] sm:$0xf]  ;;  %v4569_v12 = vld [vmem:[%s6729_s3 + $0x194] sm:$0xf0] }
 0x174   : > { %v2117_v54 = vadd.f32 %v2116_v46, %v2103_v45  ;;  %v4161_v46 = vor.u32 %v4558_v42, %v4158_v44  ;;  %v4197_v27 = vor.u32 %v4569_v12, %v4196_v11  ;;  %v4222_v44 = vld [vmem:[%s6729_s3 + $0x1c8] sm:$0xf0]  ;;  %v2265_v11 = vperm.slane %v6413_v24, 3 }
 0x176   : > { %v2253_v59 = vadd.f32 %v6117_v6, %v2117_v54  ;;  %v4073_v6 = vor.u32 %v4536_v2, %v4070_v5  ;;  %2766 = vmatpush.bf16.msrb.mxu2 %v4185_v17  ;;  %v4573_v54 = vld [vmem:[%s6729_s3 + $0x1b4] sm:$0xf0]  ;;  %v4554_v2 = vld [vmem:[%s6729_s3 + $0x124] sm:$0xf]  ;;  %v4567_v17 = vld [vmem:[%s6729_s3 + $0x184] sm:$0xf0] }
 0x178   : > { %v2271_v33 = vadd.f32 %v2263_v57, %v2253_v59  ;;  %2758 = vmatpush.bf16.msrb.mxu1 %v4073_v6  ;;  %v4153_v59 = vor.u32 %v4556_v55, %v4150_v58  ;;  %v4205_v6 = vor.u32 %v4571_v62, %v4204_v61  ;;  %v4568_v61 = vld [vmem:[%s6729_s3 + $0x194] sm:$0xf]  ;;  %v4198_v62 = vld [vmem:[%s6729_s3 + $0x198] sm:$0xf0] }
 0x179   : > { %v2104_v8 = vpop.f32.mrf.mxu2 }
 0x17a   : > { %v2105_v4 = vadd.f32 %v2104_v8, %v2091_v60  ;;  %v2279_v18 = vmax.f32 %v2271_v33, 0.0  ;;  %v4142_v8 = vld [vmem:[%s6729_s3 + $0x128] sm:$0xf0] }
 0x17b   : > { %v2118_v10 = vpop.f32.mrf.mxu3  ;;  %v4145_v33 = vor.u32 %v4554_v2, %v4142_v8 }
 0x17c   : > { %v2119_v32 = vadd.f32 %v2118_v10, %v2105_v4  ;;  %2759 = vmatpush.bf16.msrb.mxu1 %v4065_v41  ;;  %4595 = vtanh.f32 %v2279_v18  ;;  %v4550_v18 = vld [vmem:[%s6729_s3 + $0x104] sm:$0xf] }
 0x17d   : > { %2746 = vmatmul.bf16.vlgmr.msrb.gmra.mxu0 %v2294_v35  ;;  %v4229_v35 = vor.u32 %v4577_v34, %v4228_v31  ;;  %v4129_v0 = vor.u32 %v4550_v18, %v4126_v22  ;;  %v4578_v34 = vld [vmem:[%s6729_s3 + $0x1e4] sm:$0xf] }
 0x17e   : > { %v2257_v19 = vadd.f32 %v6121_v7, %v2119_v32  ;;  %v4174_v7 = vld [vmem:[%s6729_s3 + $0x168] sm:$0xf0]  ;;  %v4134_v32 = vld [vmem:[%s6729_s3 + $0x118] sm:$0xf0] }
 0x17f   : > { %v4177_v28 = vor.u32 %v4562_v25, %v4174_v7  ;;  %2726 = vmatpush.bf16.msra.mxu3 %v4229_v35  ;;  %v4137_v15 = vor.u32 %v4552_v13, %v4134_v32  ;;  %v4580_v25 = vld [vmem:[%s6729_s3 + $0x1f4] sm:$0xf]  ;;  %v4246_v7 = vld [vmem:[%s6729_s3 + $0x1f8] sm:$0xf0]  ;;  %v4238_v35 = vld [vmem:[%s6729_s3 + $0x1e8] sm:$0xf0] }
 0x180   : > { %v2275_v26 = vadd.f32 %v2263_v57, %v2257_v19  ;;  %v4213_v57 = vor.u32 %v4573_v54, %v4212_v53  ;;  %v4241_v37 = vor.u32 %v4578_v34, %v4238_v35  ;;  %v4214_v53 = vld [vmem:[%s6729_s3 + $0x1b8] sm:$0xf0] }
 0x181   : > { %2767 = vmatpush.bf16.msrb.mxu2 %v4177_v28 }
 0x182   : > { %v2283_v30 = vmax.f32 %v2275_v26, 0.0  ;;  %v4596_v45 = vpop.eup %4595 }
 0x183   : > { %2727 = vmatpush.bf16.msra.mxu3 %v4221_v43  ;;  %v4574_v43 = vld [vmem:[%s6729_s3 + $0x1c4] sm:$0xf] }
 0x184   : > { %4597 = vtanh.f32 %v2283_v30  ;;  %v4249_v30 = vor.u32 %v4580_v25, %v4246_v7 }
 0x185   : > { %2768 = vmatpush.bf16.msrb.mxu2 %v4169_v38 }
 0x187   : > { %v2130_v48 = vpop.f32.mrf.mxu0  ;;  %2728 = vmatpush.bf16.msra.mxu3 %v4213_v57  ;;  %v4206_v57 = vld [vmem:[%s6729_s3 + $0x1a8] sm:$0xf0] }
 0x189   : > { %v2144_v49 = vpop.f32.mrf.mxu1  ;;  %2769 = vmatpush.bf16.msrb.mxu2 %v4161_v46 }
 0x18a   : > { %v4598_v47 = vpop.eup %4597  ;;  %v2145_v56 = vadd.f32 %v2144_v49, %v2130_v48 }
 0x18b   : > { %v2295_v52 = vpack.c.bf16 %v4598_v47, %v4596_v45  ;;  %2729 = vmatpush.bf16.msra.mxu3 %v4205_v6  ;;  %v4225_v45 = vor.u32 %v4574_v43, %v4222_v44  ;;  %v4201_v6 = vor.u32 %v4568_v61, %v4198_v62 }
 0x18d   : > { %2704 = vmatmul.bf16.vlgmr.msra.gmra.mxu1 %v2295_v52  ;;  %2770 = vmatpush.bf16.msrb.mxu2 %v4153_v59 }
 0x18f   : > { %v2132_v10 = vpop.f32.mrf.mxu0  ;;  %2730 = vmatpush.bf16.msra.mxu3 %v4197_v27 }
 0x191   : > { %v2158_v60 = vpop.f32.mrf.mxu2  ;;  %v2146_v9 = vpop.f32.mrf.mxu1  ;;  %2771 = vmatpush.bf16.msrb.mxu2 %v4145_v33 }
 0x192   : > { %v2159_v3 = vadd.f32 %v2158_v60, %v2145_v56  ;;  %v2147_v14 = vadd.f32 %v2146_v9, %v2132_v10  ;;  %v4570_v56 = vld [vmem:[%s6729_s3 + $0x1a4] sm:$0xf]  ;;  %v4190_v10 = vld [vmem:[%s6729_s3 + $0x188] sm:$0xf0] }
 0x193   : > { %v2172_v5 = vpop.f32.mrf.mxu3  ;;  %v4209_v59 = vor.u32 %v4570_v56, %v4206_v57 }
 0x194   : > { %v2173_v4 = vadd.f32 %v2172_v5, %v2159_v3 }
 0x195   : > { %2772 = vmatpush.bf16.msrb.mxu2 %v4137_v15 }
 0x196   : > { %v2254_v41 = vadd.f32 %v6291_v63, %v2173_v4  ;;  %v4189_v63 = vor.u32 %v4567_v17, %v4188_v16  ;;  %v4566_v4 = vld [vmem:[%s6729_s3 + $0x184] sm:$0xf] }
 0x197   : > { %v4193_v13 = vor.u32 %v4566_v4, %v4190_v10 }
 0x198   : > { %v2272_v26 = vadd.f32 %v2264_v23, %v2254_v41  ;;  %2731 = vmatpush.bf16.msra.mxu3 %v4189_v63 }
 0x199   : > { %v2160_v29 = vpop.f32.mrf.mxu2  ;;  %2773 = vmatpush.bf16.msrb.mxu2 %v4129_v0 }
 0x19a   : > { %v2161_v19 = vadd.f32 %v2160_v29, %v2147_v14  ;;  %v2280_v36 = vmax.f32 %v2272_v26, 0.0 }
 0x19b   : > { %v2174_v20 = vpop.f32.mrf.mxu3 }
 0x19c   : > { %v2175_v28 = vadd.f32 %v2174_v20, %v2161_v19  ;;  %2780 = vmatpush.bf16.msrb.mxu3 %v4249_v30  ;;  %4599 = vtanh.f32 %v2280_v36 }
 0x19d   : > { %2760 = vmatmul.bf16.vlgmr.msrb.gmra.mxu1 %v2295_v52  ;;  %v4572_v52 = vld [vmem:[%s6729_s3 + $0x1b4] sm:$0xf] }
 0x19e   : > { %v2258_v31 = vadd.f32 %v6295_v1, %v2175_v28  ;;  %v4576_v1 = vld [vmem:[%s6729_s3 + $0x1d4] sm:$0xf]  ;;  %v4217_v55 = vor.u32 %v4572_v52, %v4214_v53 }
 0x19f   : > { %v4233_v42 = vor.u32 %v4576_v1, %v4230_v40 }
 0x1a0   : > { %v2276_v38 = vadd.f32 %v2264_v23, %v2258_v31  ;;  %2781 = vmatpush.bf16.msrb.mxu3 %v4241_v37 }
 0x1a2   : > { %v2284_v39 = vmax.f32 %v2276_v38, 0.0  ;;  %v4600_v46 = vpop.eup %4599 }
 0x1a4   : > { %4601 = vtanh.f32 %v2284_v39  ;;  %2782 = vmatpush.bf16.msrb.mxu3 %v4233_v42 }
 0x1a7   : > { %v2186_v47 = vpop.f32.mrf.mxu0 }
 0x1a8   : > { %2783 = vmatpush.bf16.msrb.mxu3 %v4225_v45 }
 0x1a9   : > { %v2200_v48 = vpop.f32.mrf.mxu1 }
 0x1aa   : > { %v4602_v49 = vpop.eup %4601  ;;  %v2201_v58 = vadd.f32 %v2200_v48, %v2186_v47 }
 0x1ab   : > { %v2296_v54 = vpack.c.bf16 %v4602_v49, %v4600_v46 }
 0x1ac   : > { %2784 = vmatpush.bf16.msrb.mxu3 %v4217_v55 }
 0x1ad   : > { %2718 = vmatmul.bf16.vlgmr.msra.gmra.mxu2 %v2296_v54 }
 0x1af   : > { %v2188_v8 = vpop.f32.mrf.mxu0 }
 0x1b0   : > { %2785 = vmatpush.bf16.msrb.mxu3 %v4209_v59 }
 0x1b1   : > { %v2214_v60 = vpop.f32.mrf.mxu2  ;;  %v2202_v33 = vpop.f32.mrf.mxu1 }
 0x1b2   : > { %v2215_v2 = vadd.f32 %v2214_v60, %v2201_v58  ;;  %v2203_v12 = vadd.f32 %v2202_v33, %v2188_v8 }
 0x1b3   : > { %v2228_v3 = vpop.f32.mrf.mxu3 }
 0x1b4   : > { %v2229_v5 = vadd.f32 %v2228_v3, %v2215_v2  ;;  %2786 = vmatpush.bf16.msrb.mxu3 %v4201_v6 }
 0x1b6   : > { %v2255_v9 = vadd.f32 %v6351_v50, %v2229_v5 }
 0x1b8   : > { %v2273_v32 = vadd.f32 %v2265_v11, %v2255_v9  ;;  %2787 = vmatpush.bf16.msrb.mxu3 %v4193_v13 }
 0x1b9   : > { %v2216_v14 = vpop.f32.mrf.mxu2 }
 0x1ba   : > { %v2217_v27 = vadd.f32 %v2216_v14, %v2203_v12  ;;  %v2281_v29 = vmax.f32 %v2273_v32, 0.0 }
 0x1bb   : > { %v2230_v41 = vpop.f32.mrf.mxu3 }
 0x1bc   : > { %v2231_v23 = vadd.f32 %v2230_v41, %v2217_v27  ;;  %4603 = vtanh.f32 %v2281_v29 }
 0x1bd   : > { %2774 = vmatmul.bf16.vlgmr.msrb.gmra.mxu2 %v2296_v54 }
 0x1be   : > { %v2259_v15 = vadd.f32 %v6355_v51, %v2231_v23  ;;  %v4590_v51 = vld [vmem:[%s6730_s4] ss:$0 sm:$0xff] }
 0x1c0   : > { %v2277_v16 = vadd.f32 %v2265_v11, %v2259_v15 }
 0x1c2   : > { %v2285_v17 = vmax.f32 %v2277_v16, 0.0  ;;  %v4604_v50 = vpop.eup %4603 }
 0x1c4   : > { %4605 = vtanh.f32 %v2285_v17 }
 0x1ca   : > { %v4606_v18 = vpop.eup %4605 }
 0x1cb   : > { %v2297_v24 = vpack.c.bf16 %v4606_v18, %v4604_v50 }
 0x1cd   : > { %2732 = vmatmul.bf16.vlgmr.msra.gmra.mxu3 %v2297_v24 }
 0x1dd   : > { %2788 = vmatmul.bf16.vlgmr.msrb.gmra.mxu3 %v2297_v24 }
 0x1ea   : > { %v2691_v20 = vpop.f32.mrf.mxu0 }
 0x1f2   : > { %v2693_v26 = vpop.f32.mrf.mxu0 }
 0x1fa   : > { %v2747_v40 = vpop.f32.mrf.mxu0 }
 0x202   : > { %v2749_v53 = vpop.f32.mrf.mxu0 }
 0x20a   : > { %v2705_v19 = vpop.f32.mrf.mxu1 }
 0x20b   : > { %v2706_v22 = vadd.f32 %v2705_v19, %v2691_v20 }
 0x212   : > { %v2707_v25 = vpop.f32.mrf.mxu1 }
 0x213   : > { %v2708_v34 = vadd.f32 %v2707_v25, %v2693_v26 }
 0x21a   : > { %v2761_v38 = vpop.f32.mrf.mxu1 }
 0x21b   : > { %v2762_v52 = vadd.f32 %v2761_v38, %v2747_v40 }
 0x222   : > { %v2763_v49 = vpop.f32.mrf.mxu1 }
 0x223   : > { %v2764_v55 = vadd.f32 %v2763_v49, %v2749_v53 }
 0x230   : > { %v2719_v63 = vpop.f32.mrf.mxu2 }
 0x231   : > { %v2720_v0 = vadd.f32 %v2719_v63, %v2706_v22 }
 0x238   : > { %v2721_v7 = vpop.f32.mrf.mxu2 }
 0x239   : > { %v2722_v36 = vadd.f32 %v2721_v7, %v2708_v34 }
 0x240   : > { %v2775_v42 = vpop.f32.mrf.mxu2 }
 0x241   : > { %v2776_v56 = vadd.f32 %v2775_v42, %v2762_v52 }
 0x248   : > { %v2777_v54 = vpop.f32.mrf.mxu2 }
 0x249   : > { %v2778_v58 = vadd.f32 %v2777_v54, %v2764_v55 }
 0x250   : > { %v2733_v28 = vpop.f32.mrf.mxu3 }
 0x251   : > { %v2734_v30 = vadd.f32 %v2733_v28, %v2720_v0 }
 0x253   : > { %v2798_v31 = vadd.f32 %v4590_v51, %v2734_v30 }
 0x255   : > { %v2800_v35 = vmax.f32 %v2798_v31, 0.0 }
 0x257   : > { %v4250_v37 = vmul.f32 -1.442695, %v2800_v35 }
 0x258   : > { %v2735_v39 = vpop.f32.mrf.mxu3 }
 0x259   : > { %4607 = vpow2.f32 %v4250_v37  ;;  %v2736_v1 = vadd.f32 %v2735_v39, %v2722_v36 }
 0x25b   : > { %v2799_v43 = vadd.f32 %v4590_v51, %v2736_v1 }
 0x25d   : > { %v2801_v44 = vmax.f32 %v2799_v43, 0.0 }
 0x25f   : > { %v4608_v45 = vpop.eup %4607  ;;  %v4251_v46 = vmul.f32 -1.442695, %v2801_v44 }
 0x260   : > { %v2808_v47 = vadd.f32 1.0, %v4608_v45  ;;  %v2789_v48 = vpop.f32.mrf.mxu3 }
 0x261   : > { %4609 = vpow2.f32 %v4251_v46  ;;  %v2790_v59 = vadd.f32 %v2789_v48, %v2776_v56 }
 0x262   : > { %4611 = vrcp.f32 %v2808_v47  ;;  %v2819_v33 = vand.u32 2147483647, %v2808_v47  ;;  %v2821_v4 = vand.u32 2147483648, %v2808_v47  ;;  %vm2815_vm2 = vweird.f32 %v2808_v47 }
 0x263   : > { %v2840_v6 = vrot.slane %v2790_v59, 1 }
 0x264   : > { %v2822_v32 = vor.u32 1.1754944e-38, %v2821_v4  ;;  %vm2820_vm4 = vcmp.eq.f32.partialorder %v2819_v33, 8.507059e+37 }
 0x267   : > { %v4610_v57 = vpop.eup %4609 }
 0x268   : > { %v4612_v60 = vpop.eup %4611  ;;  %v2809_v61 = vadd.f32 1.0, %v4610_v57  ;;  %v2791_v62 = vpop.f32.mrf.mxu3 }
 0x269   : > { %v2811_v2 = vmul.f32 %v4612_v60, %v2808_v47  ;;  %v2792_v3 = vadd.f32 %v2791_v62, %v2778_v58  ;;  %vm2816_vm1 = vweird.f32 %v4612_v60 }
 0x26a   : > { %4613 = vrcp.f32 %v2809_v61  ;;  %vm2817_vm3 = vmor %vm2815_vm2, %vm2816_vm1  ;;  %v2836_v18 = vand.u32 2147483648, %v2809_v61  ;;  %v2834_v19 = vand.u32 2147483647, %v2809_v61  ;;  %vm2830_vm6 = vweird.f32 %v2809_v61 }
 0x26b   : > { %v2812_v5 = vsub.f32 1.0, %v2811_v2  ;;  %v2841_v8 = vrot.slane %v2792_v3, 1 }
 0x26c   : > { %v2837_v63 = vor.u32 1.1754944e-38, %v2836_v18  ;;  %vm2835_vm8 = vcmp.eq.f32.partialorder %v2834_v19, 8.507059e+37 }
 0x26d   : > { %v2813_v10 = vmul.f32 %v4612_v60, %v2812_v5  ;;  %v2842_v9 = vsel %vm2243_vm0, %v2840_v6, %v2841_v8  ;;  %v2843_v11 = vsel %vm2243_vm0, %v2841_v8, %v2840_v6 }
 0x26e   : > { %v2844_v12 = vadd.f32 %v4590_v51, %v2842_v9  ;;  %v2845_v13 = vadd.f32 %v4590_v51, %v2843_v11 }
 0x26f   : > { %v2814_v14 = vadd.f32 %v4612_v60, %v2813_v10 }
 0x270   : > { %v4614_v27 = vpop.eup %4613  ;;  %v2846_v41 = vmax.f32 %v2844_v12, 0.0  ;;  %v2847_v23 = vmax.f32 %v2845_v13, 0.0 }
 0x271   : > { %v2818_v15 = vsel %vm2817_vm3, %v4612_v60, %v2814_v14  ;;  %v2826_v21 = vmul.f32 %v4614_v27, %v2809_v61  ;;  %vm2831_vm5 = vweird.f32 %v4614_v27 }
 0x272   : > { %v2823_v29 = vsel %vm2820_vm4, %v2822_v32, %v2818_v15  ;;  %v4252_v16 = vmul.f32 -1.442695, %v2846_v41  ;;  %v4253_v17 = vmul.f32 -1.442695, %v2847_v23  ;;  %vm2832_vm7 = vmor %vm2830_vm6, %vm2831_vm5 }
 0x273   : > { %2886 = vst [vmem:[%s6717_s25] sm:$0xff] %v2823_v29  ;;  %v2827_v50 = vsub.f32 1.0, %v2826_v21 }
 0x274   : > { %4615 = vpow2.f32 %v4252_v16 }
 0x275   : > { %v2828_v24 = vmul.f32 %v4614_v27, %v2827_v50  ;;  %4617 = vpow2.f32 %v4253_v17 }
 0x277   : > { %v2829_v20 = vadd.f32 %v4614_v27, %v2828_v24 }
 0x279   : > { %v2833_v22 = vsel %vm2832_vm7, %v4614_v27, %v2829_v20 }
 0x27a   : > { %v4616_v25 = vpop.eup %4615  ;;  %v2838_v26 = vsel %vm2835_vm8, %v2837_v63, %v2833_v22 }
 0x27b   : > { %v4618_v0 = vpop.eup %4617  ;;  %2887 = vst [vmem:[%s6717_s25 + $0x10] sm:$0x3f] %v2838_v26  ;;  %v2854_v51 = vadd.f32 1.0, %v4616_v25 }
 0x27c   : > { %v2855_v7 = vadd.f32 1.0, %v4618_v0 }
 0x27d   : > { %4619 = vrcp.f32 %v2854_v51  ;;  %v2867_v36 = vand.u32 2147483648, %v2854_v51  ;;  %v2865_v39 = vand.u32 2147483647, %v2854_v51  ;;  %vm2861_vm11 = vweird.f32 %v2854_v51 }
 0x27e   : > { %4621 = vrcp.f32 %v2855_v7  ;;  %v2882_v1 = vand.u32 2147483648, %v2855_v7  ;;  %v2880_v42 = vand.u32 2147483647, %v2855_v7  ;;  %vm2876_vm13 = vweird.f32 %v2855_v7 }
 0x27f   : > { %v2868_v44 = vor.u32 1.1754944e-38, %v2867_v36  ;;  %vm2866_vm14 = vcmp.eq.f32.partialorder %v2865_v39, 8.507059e+37 }
 0x280   : > { %v2883_v47 = vor.u32 1.1754944e-38, %v2882_v1  ;;  %vm2881_vm0 = vcmp.eq.f32.partialorder %v2880_v42, 8.507059e+37 }
 0x283   : > { %v4620_v28 = vpop.eup %4619 }
 0x284   : > { %v4622_v30 = vpop.eup %4621  ;;  %v2857_v31 = vmul.f32 %v4620_v28, %v2854_v51  ;;  %vm2862_vm9 = vweird.f32 %v4620_v28 }
 0x285   : > { %v2872_v34 = vmul.f32 %v4622_v30, %v2855_v7  ;;  %vm2877_vm10 = vweird.f32 %v4622_v30  ;;  %vm2863_vm12 = vmor %vm2861_vm11, %vm2862_vm9 }
 0x286   : > { %v2858_v35 = vsub.f32 1.0, %v2857_v31  ;;  %vm2878_vm15 = vmor %vm2876_vm13, %vm2877_vm10 }
 0x287   : > { %v2873_v37 = vsub.f32 1.0, %v2872_v34 }
 0x288   : > { %v2859_v38 = vmul.f32 %v4620_v28, %v2858_v35 }
 0x289   : > { %v2874_v40 = vmul.f32 %v4622_v30, %v2873_v37 }
 0x28a   : > { %v2860_v43 = vadd.f32 %v4620_v28, %v2859_v38 }
 0x28b   : > { %v2875_v45 = vadd.f32 %v4622_v30, %v2874_v40 }
 0x28c   : > { %v2864_v46 = vsel %vm2863_vm12, %v4620_v28, %v2860_v43 }
 0x28d   : > { %v2869_v48 = vsel %vm2866_vm14, %v2868_v44, %v2864_v46  ;;  %v2879_v49 = vsel %vm2878_vm15, %v4622_v30, %v2875_v45 }
 0x28e   : > { %v2884_v52 = vsel %vm2881_vm0, %v2883_v47, %v2879_v49  ;;  %2888 = vst [vmem:[%s6717_s25 + $0x8] sm:$0xff] %v2869_v48 }
 0x28f   : > { %2889 = vst [vmem:[%s6717_s25 + $0x18] sm:$0x3f] %v2884_v52 }
 0x290 PF: > { %s15_s18 = sadd.s32 1, %s4629_s18  }
 0x291   : > { %p12_p4 = scmp.ge.s32.totalorder %s15_s18, 4  }
 0x293   :  { %14 = sbr.rel (!%p12_p4) target bundleno = 1 (0x1), region = 70 }

</bundles_post_ra>
